<compile_context>
chip_gen: v6e
topology: v6e:2x2x1
jax: 0.10.0
libtpu: 0.0.40
codegen_flags: <defaults>
</compile_context>

<pallas_src>
import jax
import jax.numpy as jnp
from jax.experimental import pallas as pl
from jax.experimental.pallas import tpu as pltpu


def _round_up(x, m):
    return (x + m - 1) // m * m


def _pad_axis(x, axis, target):
    cur = x.shape[axis]
    if cur == target:
        return x
    widths = [(0, 0)] * x.ndim
    widths[axis] = (0, target - cur)
    return jnp.pad(x, widths)


# ----------------------------- Pallas kernels ------------------------------

def _conv_relu_pool_kernel(p_ref, w_ref, b_ref, o_ref):
    """Fused conv(im2col GEMM) + bias + 2x2 max-pool + ReLU.

    p_ref : (4, Kp, TM)  im2col patches, one slab per pool-window offset
    w_ref : (Cop, Kp)    flattened conv weights (zero padded)
    b_ref : (Cop, 1)     bias (zero padded)
    o_ref : (Cop, TM)    pooled activations, lane-dense over batch*spatial
    """
    w = w_ref[...]
    a0 = jnp.dot(w, p_ref[0], preferred_element_type=jnp.float32)
    a1 = jnp.dot(w, p_ref[1], preferred_element_type=jnp.float32)
    a2 = jnp.dot(w, p_ref[2], preferred_element_type=jnp.float32)
    a3 = jnp.dot(w, p_ref[3], preferred_element_type=jnp.float32)
    acc = jnp.maximum(jnp.maximum(a0, a1), jnp.maximum(a2, a3))   # 2x2 max-pool (VPU)
    acc = acc + b_ref[...]                                         # bias (lane broadcast)
    o_ref[...] = jnp.maximum(acc, 0.0).astype(o_ref.dtype)         # ReLU (= pool(relu(.)))


def _fc_stack_kernel(x_ref, w1_ref, b1_ref, w2_ref, b2_ref, w3_ref, b3_ref, o_ref):
    """fc1+ReLU -> fc2+ReLU -> fc3, fused; intermediates stay in VMEM/vregs."""
    h = jnp.dot(x_ref[...], w1_ref[...], preferred_element_type=jnp.float32) + b1_ref[...]
    h = jnp.maximum(h, 0.0)
    h = jnp.dot(h, w2_ref[...], preferred_element_type=jnp.float32) + b2_ref[...]
    h = jnp.maximum(h, 0.0)
    h = jnp.dot(h, w3_ref[...], preferred_element_type=jnp.float32) + b3_ref[...]
    o_ref[...] = h.astype(o_ref.dtype)


# ------------------------------ wrappers ------------------------------------

def _im2col_pool_T(x, KH, KW):
    """x: (C, N, H, W) -> (4, C*KH*KW, N*Hp*Wp).

    Axis 0 indexes the 2x2 pool-window offset (dh*2 + dw); K ordered (c, kh, kw)
    to match torch's w.reshape(Cout, Cin*KH*KW); M ordered (n, ph, pw).
    """
    C, N, H, W = x.shape
    Ho, Wo = H - KH + 1, W - KW + 1
    Hp, Wp = Ho // 2, Wo // 2
    offs = []
    for dh in range(2):
        for dw in range(2):
            cols = []
            for kh in range(KH):
                for kw in range(KW):
                    h0 = dh + kh
                    w0 = dw + kw
                    sl = x[:, :, h0:h0 + 2 * Hp - 1:2, w0:w0 + 2 * Wp - 1:2]  # (C,N,Hp,Wp)
                    cols.append(sl)
            pk = jnp.stack(cols, axis=1)                       # (C, KH*KW, N, Hp, Wp)
            offs.append(pk.reshape(C * KH * KW, N * Hp * Wp))  # (K, M)
    return jnp.stack(offs, axis=0)                             # (4, K, M)


def conv2d_relu_pool(x_cnhw, w, b, *, tm_max=512):
    """Conv2d(stride 1, no pad) + ReLU + MaxPool2d(2,2).  x: (C,N,H,W) -> (Cout,N,Hp,Wp)."""
    Cin, N, H, W = x_cnhw.shape
    Cout, Cin2, KH, KW = w.shape
    assert Cin == Cin2
    Ho, Wo = H - KH + 1, W - KW + 1
    assert Ho % 2 == 0 and Wo % 2 == 0
    Hp, Wp = Ho // 2, Wo // 2

    M = N * Hp * Wp
    K = Cin * KH * KW
    Kp = _round_up(K, 8)                 # clean sublane tiles for patches
    Cop = _round_up(Cout, 8)             # clean sublane tiles for output
    TM = min(tm_max, _round_up(M, 128))  # lane tile (multiple of 128)
    Mp = _round_up(M, TM)

    patches = _im2col_pool_T(x_cnhw, KH, KW)                 # (4, K, M)
    patches = _pad_axis(_pad_axis(patches, 1, Kp), 2, Mp)    # (4, Kp, Mp)
    w_mat = _pad_axis(_pad_axis(w.reshape(Cout, K), 0, Cop), 1, Kp)   # (Cop, Kp)
    b_mat = _pad_axis(b.reshape(Cout, 1), 0, Cop)                      # (Cop, 1)

    out = pl.pallas_call(
        _conv_relu_pool_kernel,
        out_shape=jax.ShapeDtypeStruct((Cop, Mp), jnp.float32),
        grid=(Mp // TM,),
        in_specs=[
            pl.BlockSpec((4, Kp, TM), lambda i: (0, 0, i)),
            pl.BlockSpec((Cop, Kp), lambda i: (0, 0)),
            pl.BlockSpec((Cop, 1), lambda i: (0, 0)),
        ],
        out_specs=pl.BlockSpec((Cop, TM), lambda i: (0, i)),
        compiler_params=pltpu.CompilerParams(dimension_semantics=("parallel",)),
    )(patches, w_mat, b_mat)

    return out[:Cout, :M].reshape(Cout, N, Hp, Wp)


def fc_stack(x, p):
    """Fused fc1+ReLU, fc2+ReLU, fc3.  x: (N, 400) -> (N, 10)."""
    Nb, K1 = x.shape
    NP = 128  # padded hidden/output lane width
    w1t = _pad_axis(p["fc1_w"].T, 1, NP)                       # (400, 128)
    b1 = _pad_axis(p["fc1_b"].reshape(1, -1), 1, NP)           # (1, 128)
    w2t = _pad_axis(_pad_axis(p["fc2_w"].T, 0, NP), 1, NP)     # (128, 128)
    b2 = _pad_axis(p["fc2_b"].reshape(1, -1), 1, NP)
    w3t = _pad_axis(_pad_axis(p["fc3_w"].T, 0, NP), 1, NP)     # (128, 128)
    b3 = _pad_axis(p["fc3_b"].reshape(1, -1), 1, NP)

    out = pl.pallas_call(
        _fc_stack_kernel,
        out_shape=jax.ShapeDtypeStruct((Nb, NP), jnp.float32),
        grid=(1,),
        in_specs=[
            pl.BlockSpec((Nb, K1), lambda i: (0, 0)),
            pl.BlockSpec((K1, NP), lambda i: (0, 0)),
            pl.BlockSpec((1, NP), lambda i: (0, 0)),
            pl.BlockSpec((NP, NP), lambda i: (0, 0)),
            pl.BlockSpec((1, NP), lambda i: (0, 0)),
            pl.BlockSpec((NP, NP), lambda i: (0, 0)),
            pl.BlockSpec((1, NP), lambda i: (0, 0)),
        ],
        out_specs=pl.BlockSpec((Nb, NP), lambda i: (0, 0)),
        compiler_params=pltpu.CompilerParams(dimension_semantics=("arbitrary",)),
    )(x, w1t, b1, w2t, b2, w3t, b3)
    return out[:, :10]


# ------------------------------ the network ---------------------------------

def init_params(key):
    def uinit(k, shape, fan_in):
        bound = 1.0 / jnp.sqrt(jnp.float32(fan_in))
        return jax.random.uniform(k, shape, jnp.float32, -bound, bound)

    ks = jax.random.split(key, 10)
    return {
        "conv1_w": uinit(ks[0], (6, 3, 5, 5), 3 * 5 * 5),
        "conv1_b": uinit(ks[1], (6,), 3 * 5 * 5),
        "conv2_w": uinit(ks[2], (16, 6, 5, 5), 6 * 5 * 5),
        "conv2_b": uinit(ks[3], (16,), 6 * 5 * 5),
        "fc1_w": uinit(ks[4], (120, 400), 400),
        "fc1_b": uinit(ks[5], (120,), 400),
        "fc2_w": uinit(ks[6], (84, 120), 120),
        "fc2_b": uinit(ks[7], (84,), 120),
        "fc3_w": uinit(ks[8], (10, 84), 84),
        "fc3_b": uinit(ks[9], (10,), 84),
    }


def net_forward(x, p):
    # x: (N, 3, 32, 32) NCHW (PyTorch convention)
    xc = jnp.transpose(x, (1, 0, 2, 3))                          # (C, N, H, W), once
    y1 = conv2d_relu_pool(xc, p["conv1_w"], p["conv1_b"])        # (6, N, 14, 14)
    y2 = conv2d_relu_pool(y1, p["conv2_w"], p["conv2_b"])        # (16, N, 5, 5)
    N = y2.shape[1]
    flat = jnp.transpose(y2, (1, 0, 2, 3)).reshape(N, 16 * 5 * 5)  # == x.view(-1, 400)
    return fc_stack(flat, p)                                     # (N, 10)


if __name__ == "__main__":
    key = jax.random.PRNGKey(0)
    k_x, k_p = jax.random.split(key)
    # CIFAR-10 shaped input; fc1 in-features (16*5*5) force 3x32x32 spatial.
    x = jax.random.normal(k_x, (2, 3, 32, 32), jnp.float32)
    params = init_params(k_p)

    fwd = jax.jit(net_forward)
    out = jax.block_until_ready(fwd(x, params))
    assert out.shape == (2, 10), out.shape
    assert out.dtype == jnp.float32
    assert bool(jnp.all(jnp.isfinite(out)))
    print("KERNEL_OK")
</pallas_src>

<mosaic_0001>
module attributes {stable_mosaic.version = 11 : i64} {
  func.func @_conv_relu_pool_kernel(%arg0: i32, %arg1: memref<4x80x512xf32, #tpu.memory_space<vmem>>, %arg2: memref<8x80xf32, #tpu.memory_space<vmem>>, %arg3: memref<8x1xf32, #tpu.memory_space<vmem>>, %arg4: memref<8x512xf32, #tpu.memory_space<vmem>>) attributes {dimension_semantics = [#tpu.dimension_semantics<parallel>], iteration_bounds = array<i64: 1>, scalar_prefetch = 0 : i64, scratch_operands = 0 : i64, tpu.core_type = #tpu.core_type<tc>, window_params = [{transform_indices = @transform_0, window_bounds = array<i64: 4, 80, 512>}, {pipeline_mode = #tpu.pipeline_mode<synchronous>, transform_indices = @transform_1, window_bounds = array<i64: 8, 80>}, {pipeline_mode = #tpu.pipeline_mode<synchronous>, transform_indices = @transform_2, window_bounds = array<i64: 8, 1>}, {transform_indices = @transform_3, window_bounds = array<i64: 8, 512>}]} {
    %c0 = arith.constant 0 : index
    %c0_0 = arith.constant 0 : index
    %0 = vector.load %arg2[%c0, %c0_0] : memref<8x80xf32, #tpu.memory_space<vmem>>, vector<8x80xf32>
    %c0_1 = arith.constant 0 : index
    %c0_2 = arith.constant 0 : index
    %c0_3 = arith.constant 0 : index
    %1 = vector.load %arg1[%c0_1, %c0_2, %c0_3] : memref<4x80x512xf32, #tpu.memory_space<vmem>>, vector<1x80x512xf32>
    %2 = vector.shape_cast %1 : vector<1x80x512xf32> to vector<80x512xf32>
    %cst = arith.constant dense<0.000000e+00> : vector<8x512xf32>
    %3 = tpu.matmul %0, %2, %cst {dimension_numbers = #tpu.dot_dimension_numbers<[1], [0], [0], [1], [0, 0, 1, 1], [], []>} : vector<8x80xf32>, vector<80x512xf32>, vector<8x512xf32> -> vector<8x512xf32>
    %c1 = arith.constant 1 : index
    %c0_4 = arith.constant 0 : index
    %c0_5 = arith.constant 0 : index
    %4 = vector.load %arg1[%c1, %c0_4, %c0_5] : memref<4x80x512xf32, #tpu.memory_space<vmem>>, vector<1x80x512xf32>
    %5 = vector.shape_cast %4 : vector<1x80x512xf32> to vector<80x512xf32>
    %cst_6 = arith.constant dense<0.000000e+00> : vector<8x512xf32>
    %6 = tpu.matmul %0, %5, %cst_6 {dimension_numbers = #tpu.dot_dimension_numbers<[1], [0], [0], [1], [0, 0, 1, 1], [], []>} : vector<8x80xf32>, vector<80x512xf32>, vector<8x512xf32> -> vector<8x512xf32>
    %c2 = arith.constant 2 : index
    %c0_7 = arith.constant 0 : index
    %c0_8 = arith.constant 0 : index
    %7 = vector.load %arg1[%c2, %c0_7, %c0_8] : memref<4x80x512xf32, #tpu.memory_space<vmem>>, vector<1x80x512xf32>
    %8 = vector.shape_cast %7 : vector<1x80x512xf32> to vector<80x512xf32>
    %cst_9 = arith.constant dense<0.000000e+00> : vector<8x512xf32>
    %9 = tpu.matmul %0, %8, %cst_9 {dimension_numbers = #tpu.dot_dimension_numbers<[1], [0], [0], [1], [0, 0, 1, 1], [], []>} : vector<8x80xf32>, vector<80x512xf32>, vector<8x512xf32> -> vector<8x512xf32>
    %c3 = arith.constant 3 : index
    %c0_10 = arith.constant 0 : index
    %c0_11 = arith.constant 0 : index
    %10 = vector.load %arg1[%c3, %c0_10, %c0_11] : memref<4x80x512xf32, #tpu.memory_space<vmem>>, vector<1x80x512xf32>
    %11 = vector.shape_cast %10 : vector<1x80x512xf32> to vector<80x512xf32>
    %cst_12 = arith.constant dense<0.000000e+00> : vector<8x512xf32>
    %12 = tpu.matmul %0, %11, %cst_12 {dimension_numbers = #tpu.dot_dimension_numbers<[1], [0], [0], [1], [0, 0, 1, 1], [], []>} : vector<8x80xf32>, vector<80x512xf32>, vector<8x512xf32> -> vector<8x512xf32>
    %13 = arith.maximumf %3, %6 : vector<8x512xf32>
    %14 = arith.maximumf %9, %12 : vector<8x512xf32>
    %15 = arith.maximumf %13, %14 : vector<8x512xf32>
    %c0_13 = arith.constant 0 : index
    %c0_14 = arith.constant 0 : index
    %16 = vector.load %arg3[%c0_13, %c0_14] : memref<8x1xf32, #tpu.memory_space<vmem>>, vector<8x1xf32>
    %17 = vector.broadcast %16 : vector<8x1xf32> to vector<8x512xf32>
    %18 = arith.addf %15, %17 : vector<8x512xf32>
    %cst_15 = arith.constant 0.000000e+00 : f32
    %19 = vector.broadcast %cst_15 : f32 to vector<8x512xf32>
    %20 = arith.maximumf %18, %19 : vector<8x512xf32>
    %c0_16 = arith.constant 0 : index
    %c0_17 = arith.constant 0 : index
    %21 = vector.load %arg4[%c0_16, %c0_17] : memref<8x512xf32, #tpu.memory_space<vmem>>, vector<8x512xf32>
    tpu.vector_store %arg4[%c0_16, %c0_17], %20 {strides = array<i32>} : memref<8x512xf32, #tpu.memory_space<vmem>>, vector<8x512xf32>,
    return
  }
  func.func @transform_0(%arg0: i32) -> (i32, i32, i32) {
    %c0_i32 = arith.constant 0 : i32
    %c0_i32_0 = arith.constant 0 : i32
    %c0_i32_1 = arith.constant 0 : i32
    return %c0_i32, %c0_i32_0, %arg0 : i32, i32, i32
  }
  func.func @transform_1(%arg0: i32) -> (i32, i32) {
    %c0_i32 = arith.constant 0 : i32
    %c0_i32_0 = arith.constant 0 : i32
    %c0_i32_1 = arith.constant 0 : i32
    return %c0_i32, %c0_i32_0 : i32, i32
  }
  func.func @transform_2(%arg0: i32) -> (i32, i32) {
    %c0_i32 = arith.constant 0 : i32
    %c0_i32_0 = arith.constant 0 : i32
    %c0_i32_1 = arith.constant 0 : i32
    return %c0_i32, %c0_i32_0 : i32, i32
  }
  func.func @transform_3(%arg0: i32) -> (i32, i32) {
    %c0_i32 = arith.constant 0 : i32
    %c0_i32_0 = arith.constant 0 : i32
    return %c0_i32, %arg0 : i32, i32
  }
}

module attributes {stable_mosaic.version = 11 : i64} {
  func.func @_conv_relu_pool_kernel(%arg0: i32, %arg1: memref<4x152x128xf32, #tpu.memory_space<vmem>>, %arg2: memref<16x152xf32, #tpu.memory_space<vmem>>, %arg3: memref<16x1xf32, #tpu.memory_space<vmem>>, %arg4: memref<16x128xf32, #tpu.memory_space<vmem>>) attributes {dimension_semantics = [#tpu.dimension_semantics<parallel>], iteration_bounds = array<i64: 1>, scalar_prefetch = 0 : i64, scratch_operands = 0 : i64, tpu.core_type = #tpu.core_type<tc>, window_params = [{transform_indices = @transform_0, window_bounds = array<i64: 4, 152, 128>}, {pipeline_mode = #tpu.pipeline_mode<synchronous>, transform_indices = @transform_1, window_bounds = array<i64: 16, 152>}, {pipeline_mode = #tpu.pipeline_mode<synchronous>, transform_indices = @transform_2, window_bounds = array<i64: 16, 1>}, {transform_indices = @transform_3, window_bounds = array<i64: 16, 128>}]} {
    %c0 = arith.constant 0 : index
    %c0_0 = arith.constant 0 : index
    %0 = vector.load %arg2[%c0, %c0_0] : memref<16x152xf32, #tpu.memory_space<vmem>>, vector<16x152xf32>
    %c0_1 = arith.constant 0 : index
    %c0_2 = arith.constant 0 : index
    %c0_3 = arith.constant 0 : index
    %1 = vector.load %arg1[%c0_1, %c0_2, %c0_3] : memref<4x152x128xf32, #tpu.memory_space<vmem>>, vector<1x152x128xf32>
    %2 = vector.shape_cast %1 : vector<1x152x128xf32> to vector<152x128xf32>
    %cst = arith.constant dense<0.000000e+00> : vector<16x128xf32>
    %3 = tpu.matmul %0, %2, %cst {dimension_numbers = #tpu.dot_dimension_numbers<[1], [0], [0], [1], [0, 0, 1, 1], [], []>} : vector<16x152xf32>, vector<152x128xf32>, vector<16x128xf32> -> vector<16x128xf32>
    %c1 = arith.constant 1 : index
    %c0_4 = arith.constant 0 : index
    %c0_5 = arith.constant 0 : index
    %4 = vector.load %arg1[%c1, %c0_4, %c0_5] : memref<4x152x128xf32, #tpu.memory_space<vmem>>, vector<1x152x128xf32>
    %5 = vector.shape_cast %4 : vector<1x152x128xf32> to vector<152x128xf32>
    %cst_6 = arith.constant dense<0.000000e+00> : vector<16x128xf32>
    %6 = tpu.matmul %0, %5, %cst_6 {dimension_numbers = #tpu.dot_dimension_numbers<[1], [0], [0], [1], [0, 0, 1, 1], [], []>} : vector<16x152xf32>, vector<152x128xf32>, vector<16x128xf32> -> vector<16x128xf32>
    %c2 = arith.constant 2 : index
    %c0_7 = arith.constant 0 : index
    %c0_8 = arith.constant 0 : index
    %7 = vector.load %arg1[%c2, %c0_7, %c0_8] : memref<4x152x128xf32, #tpu.memory_space<vmem>>, vector<1x152x128xf32>
    %8 = vector.shape_cast %7 : vector<1x152x128xf32> to vector<152x128xf32>
    %cst_9 = arith.constant dense<0.000000e+00> : vector<16x128xf32>
    %9 = tpu.matmul %0, %8, %cst_9 {dimension_numbers = #tpu.dot_dimension_numbers<[1], [0], [0], [1], [0, 0, 1, 1], [], []>} : vector<16x152xf32>, vector<152x128xf32>, vector<16x128xf32> -> vector<16x128xf32>
    %c3 = arith.constant 3 : index
    %c0_10 = arith.constant 0 : index
    %c0_11 = arith.constant 0 : index
    %10 = vector.load %arg1[%c3, %c0_10, %c0_11] : memref<4x152x128xf32, #tpu.memory_space<vmem>>, vector<1x152x128xf32>
    %11 = vector.shape_cast %10 : vector<1x152x128xf32> to vector<152x128xf32>
    %cst_12 = arith.constant dense<0.000000e+00> : vector<16x128xf32>
    %12 = tpu.matmul %0, %11, %cst_12 {dimension_numbers = #tpu.dot_dimension_numbers<[1], [0], [0], [1], [0, 0, 1, 1], [], []>} : vector<16x152xf32>, vector<152x128xf32>, vector<16x128xf32> -> vector<16x128xf32>
    %13 = arith.maximumf %3, %6 : vector<16x128xf32>
    %14 = arith.maximumf %9, %12 : vector<16x128xf32>
    %15 = arith.maximumf %13, %14 : vector<16x128xf32>
    %c0_13 = arith.constant 0 : index
    %c0_14 = arith.constant 0 : index
    %16 = vector.load %arg3[%c0_13, %c0_14] : memref<16x1xf32, #tpu.memory_space<vmem>>, vector<16x1xf32>
    %17 = vector.broadcast %16 : vector<16x1xf32> to vector<16x128xf32>
    %18 = arith.addf %15, %17 : vector<16x128xf32>
    %cst_15 = arith.constant 0.000000e+00 : f32
    %19 = vector.broadcast %cst_15 : f32 to vector<16x128xf32>
    %20 = arith.maximumf %18, %19 : vector<16x128xf32>
    %c0_16 = arith.constant 0 : index
    %c0_17 = arith.constant 0 : index
    %21 = vector.load %arg4[%c0_16, %c0_17] : memref<16x128xf32, #tpu.memory_space<vmem>>, vector<16x128xf32>
    tpu.vector_store %arg4[%c0_16, %c0_17], %20 {strides = array<i32>} : memref<16x128xf32, #tpu.memory_space<vmem>>, vector<16x128xf32>,
    return
  }
  func.func @transform_0(%arg0: i32) -> (i32, i32, i32) {
    %c0_i32 = arith.constant 0 : i32
    %c0_i32_0 = arith.constant 0 : i32
    %c0_i32_1 = arith.constant 0 : i32
    return %c0_i32, %c0_i32_0, %arg0 : i32, i32, i32
  }
  func.func @transform_1(%arg0: i32) -> (i32, i32) {
    %c0_i32 = arith.constant 0 : i32
    %c0_i32_0 = arith.constant 0 : i32
    %c0_i32_1 = arith.constant 0 : i32
    return %c0_i32, %c0_i32_0 : i32, i32
  }
  func.func @transform_2(%arg0: i32) -> (i32, i32) {
    %c0_i32 = arith.constant 0 : i32
    %c0_i32_0 = arith.constant 0 : i32
    %c0_i32_1 = arith.constant 0 : i32
    return %c0_i32, %c0_i32_0 : i32, i32
  }
  func.func @transform_3(%arg0: i32) -> (i32, i32) {
    %c0_i32 = arith.constant 0 : i32
    %c0_i32_0 = arith.constant 0 : i32
    return %c0_i32, %arg0 : i32, i32
  }
}

module attributes {stable_mosaic.version = 11 : i64} {
  func.func @_fc_stack_kernel(%arg0: i32, %arg1: memref<2x400xf32, #tpu.memory_space<vmem>>, %arg2: memref<400x128xf32, #tpu.memory_space<vmem>>, %arg3: memref<1x128xf32, #tpu.memory_space<vmem>>, %arg4: memref<128x128xf32, #tpu.memory_space<vmem>>, %arg5: memref<1x128xf32, #tpu.memory_space<vmem>>, %arg6: memref<128x128xf32, #tpu.memory_space<vmem>>, %arg7: memref<1x128xf32, #tpu.memory_space<vmem>>, %arg8: memref<2x128xf32, #tpu.memory_space<vmem>>) attributes {dimension_semantics = [#tpu.dimension_semantics<arbitrary>], iteration_bounds = array<i64: 1>, scalar_prefetch = 0 : i64, scratch_operands = 0 : i64, tpu.core_type = #tpu.core_type<tc>, window_params = [{pipeline_mode = #tpu.pipeline_mode<synchronous>, transform_indices = @transform_0, window_bounds = array<i64: 2, 400>}, {pipeline_mode = #tpu.pipeline_mode<synchronous>, transform_indices = @transform_1, window_bounds = array<i64: 400, 128>}, {pipeline_mode = #tpu.pipeline_mode<synchronous>, transform_indices = @transform_2, window_bounds = array<i64: 1, 128>}, {pipeline_mode = #tpu.pipeline_mode<synchronous>, transform_indices = @transform_3, window_bounds = array<i64: 128, 128>}, {pipeline_mode = #tpu.pipeline_mode<synchronous>, transform_indices = @transform_4, window_bounds = array<i64: 1, 128>}, {pipeline_mode = #tpu.pipeline_mode<synchronous>, transform_indices = @transform_5, window_bounds = array<i64: 128, 128>}, {pipeline_mode = #tpu.pipeline_mode<synchronous>, transform_indices = @transform_6, window_bounds = array<i64: 1, 128>}, {pipeline_mode = #tpu.pipeline_mode<synchronous>, transform_indices = @transform_7, window_bounds = array<i64: 2, 128>}]} {
    %c0 = arith.constant 0 : index
    %c0_0 = arith.constant 0 : index
    %0 = vector.load %arg1[%c0, %c0_0] : memref<2x400xf32, #tpu.memory_space<vmem>>, vector<2x400xf32>
    %c0_1 = arith.constant 0 : index
    %c0_2 = arith.constant 0 : index
    %1 = vector.load %arg2[%c0_1, %c0_2] : memref<400x128xf32, #tpu.memory_space<vmem>>, vector<400x128xf32>
    %cst = arith.constant dense<0.000000e+00> : vector<2x128xf32>
    %2 = tpu.matmul %0, %1, %cst {dimension_numbers = #tpu.dot_dimension_numbers<[1], [0], [0], [1], [0, 0, 1, 1], [], []>} : vector<2x400xf32>, vector<400x128xf32>, vector<2x128xf32> -> vector<2x128xf32>
    %c0_3 = arith.constant 0 : index
    %c0_4 = arith.constant 0 : index
    %3 = vector.load %arg3[%c0_3, %c0_4] : memref<1x128xf32, #tpu.memory_space<vmem>>, vector<1x128xf32>
    %4 = vector.broadcast %3 : vector<1x128xf32> to vector<2x128xf32>
    %5 = arith.addf %2, %4 : vector<2x128xf32>
    %cst_5 = arith.constant 0.000000e+00 : f32
    %6 = vector.broadcast %cst_5 : f32 to vector<2x128xf32>
    %7 = arith.maximumf %5, %6 : vector<2x128xf32>
    %c0_6 = arith.constant 0 : index
    %c0_7 = arith.constant 0 : index
    %8 = vector.load %arg4[%c0_6, %c0_7] : memref<128x128xf32, #tpu.memory_space<vmem>>, vector<128x128xf32>
    %cst_8 = arith.constant dense<0.000000e+00> : vector<2x128xf32>
    %9 = tpu.matmul %7, %8, %cst_8 {dimension_numbers = #tpu.dot_dimension_numbers<[1], [0], [0], [1], [0, 0, 1, 1], [], []>} : vector<2x128xf32>, vector<128x128xf32>, vector<2x128xf32> -> vector<2x128xf32>
    %c0_9 = arith.constant 0 : index
    %c0_10 = arith.constant 0 : index
    %10 = vector.load %arg5[%c0_9, %c0_10] : memref<1x128xf32, #tpu.memory_space<vmem>>, vector<1x128xf32>
    %11 = vector.broadcast %10 : vector<1x128xf32> to vector<2x128xf32>
    %12 = arith.addf %9, %11 : vector<2x128xf32>
    %cst_11 = arith.constant 0.000000e+00 : f32
    %13 = vector.broadcast %cst_11 : f32 to vector<2x128xf32>
    %14 = arith.maximumf %12, %13 : vector<2x128xf32>
    %c0_12 = arith.constant 0 : index
    %c0_13 = arith.constant 0 : index
    %15 = vector.load %arg6[%c0_12, %c0_13] : memref<128x128xf32, #tpu.memory_space<vmem>>, vector<128x128xf32>
    %cst_14 = arith.constant dense<0.000000e+00> : vector<2x128xf32>
    %16 = tpu.matmul %14, %15, %cst_14 {dimension_numbers = #tpu.dot_dimension_numbers<[1], [0], [0], [1], [0, 0, 1, 1], [], []>} : vector<2x128xf32>, vector<128x128xf32>, vector<2x128xf32> -> vector<2x128xf32>
    %c0_15 = arith.constant 0 : index
    %c0_16 = arith.constant 0 : index
    %17 = vector.load %arg7[%c0_15, %c0_16] : memref<1x128xf32, #tpu.memory_space<vmem>>, vector<1x128xf32>
    %18 = vector.broadcast %17 : vector<1x128xf32> to vector<2x128xf32>
    %19 = arith.addf %16, %18 : vector<2x128xf32>
    %c0_17 = arith.constant 0 : index
    %c0_18 = arith.constant 0 : index
    %20 = vector.load %arg8[%c0_17, %c0_18] : memref<2x128xf32, #tpu.memory_space<vmem>>, vector<2x128xf32>
    tpu.vector_store %arg8[%c0_17, %c0_18], %19 {strides = array<i32>} : memref<2x128xf32, #tpu.memory_space<vmem>>, vector<2x128xf32>,
    return
  }
  func.func @transform_0(%arg0: i32) -> (i32, i32) {
    %c0_i32 = arith.constant 0 : i32
    %c0_i32_0 = arith.constant 0 : i32
    %c0_i32_1 = arith.constant 0 : i32
    return %c0_i32, %c0_i32_0 : i32, i32
  }
  func.func @transform_1(%arg0: i32) -> (i32, i32) {
    %c0_i32 = arith.constant 0 : i32
    %c0_i32_0 = arith.constant 0 : i32
    %c0_i32_1 = arith.constant 0 : i32
    return %c0_i32, %c0_i32_0 : i32, i32
  }
  func.func @transform_2(%arg0: i32) -> (i32, i32) {
    %c0_i32 = arith.constant 0 : i32
    %c0_i32_0 = arith.constant 0 : i32
    %c0_i32_1 = arith.constant 0 : i32
    return %c0_i32, %c0_i32_0 : i32, i32
  }
  func.func @transform_3(%arg0: i32) -> (i32, i32) {
    %c0_i32 = arith.constant 0 : i32
    %c0_i32_0 = arith.constant 0 : i32
    %c0_i32_1 = arith.constant 0 : i32
    return %c0_i32, %c0_i32_0 : i32, i32
  }
  func.func @transform_4(%arg0: i32) -> (i32, i32) {
    %c0_i32 = arith.constant 0 : i32
    %c0_i32_0 = arith.constant 0 : i32
    %c0_i32_1 = arith.constant 0 : i32
    return %c0_i32, %c0_i32_0 : i32, i32
  }
  func.func @transform_5(%arg0: i32) -> (i32, i32) {
    %c0_i32 = arith.constant 0 : i32
    %c0_i32_0 = arith.constant 0 : i32
    %c0_i32_1 = arith.constant 0 : i32
    return %c0_i32, %c0_i32_0 : i32, i32
  }
  func.func @transform_6(%arg0: i32) -> (i32, i32) {
    %c0_i32 = arith.constant 0 : i32
    %c0_i32_0 = arith.constant 0 : i32
    %c0_i32_1 = arith.constant 0 : i32
    return %c0_i32, %c0_i32_0 : i32, i32
  }
  func.func @transform_7(%arg0: i32) -> (i32, i32) {
    %c0_i32 = arith.constant 0 : i32
    %c0_i32_0 = arith.constant 0 : i32
    %c0_i32_1 = arith.constant 0 : i32
    return %c0_i32, %c0_i32_0 : i32, i32
  }
}

</mosaic_0001>

<bundles_post_ra>
// kernel: net_forward.3
= control target key start
LH: loop header
LB: loop body
LE: loop exit
PB: predicated region body
PF: predicated region fallthrough
CT: control target
= control target key end

     0   :  { %v915_v3 = vmov 0.0   ;;  %vm55_vm0 = vcmask 654336   ;;  %s1461_s0 = inlined_call_operand.vmem [shape: f32[4,80,512], index: 0, kind: input, shape index: {}]   ;;  %s1462_s1 = inlined_call_operand.vmem [shape: f32[8,80], index: 1, kind: input, shape index: {}]   ;;  %s1463_s2 = inlined_call_operand.vmem [shape: f32[8,1], index: 2, kind: input, shape index: {}]   ;;  %s1464_s3 = inlined_call_operand.vmem [shape: f32[8,512], index: 3, kind: output, shape index: {}]  }
   0x1   :  { %v52_v0 = vld [vmem:[%s1461_s0 + $0x128] sm:$0xff]  ;;  %v54_v1 = vld [vmem:[%s1461_s0 + $0x138] sm:$0xff]  ;;  %v51_v2 = vld [vmem:[%s1461_s0 + $0x120] sm:$0xff]  ;;  %123 = vmatprep.mubr.f32.mxu0 %v915_v3  ;;  %194 = vmatprep.mubr.f32.mxu1 %v915_v3 }
   0x2   :  { %71 = vmatprep.subr.mxu0 %v52_v0  ;;  %142 = vmatprep.subr.mxu1 %v54_v1  ;;  %v53_v4 = vld [vmem:[%s1461_s0 + $0x130] sm:$0xff]  ;;  %v48_v5 = vld [vmem:[%s1461_s0 + $0x108] sm:$0xff]  ;;  %v50_v6 = vld [vmem:[%s1461_s0 + $0x118] sm:$0xff] }
   0x3   :  { %72 = vmatpush1.msra.mxu0 %v51_v2  ;;  %143 = vmatpush1.msra.mxu1 %v53_v4  ;;  %v47_v7 = vld [vmem:[%s1461_s0 + $0x100] sm:$0xff]  ;;  %v49_v8 = vld [vmem:[%s1461_s0 + $0x110] sm:$0xff]  ;;  %v44_v9 = vld [vmem:[%s1461_s0 + $0xe8] sm:$0xff] }
   0x4   :  { %73 = vmatprep.subr.mxu0 %v48_v5  ;;  %144 = vmatprep.subr.mxu1 %v50_v6  ;;  %v46_v10 = vld [vmem:[%s1461_s0 + $0xf8] sm:$0xff]  ;;  %v43_v11 = vld [vmem:[%s1461_s0 + $0xe0] sm:$0xff]  ;;  %v45_v12 = vld [vmem:[%s1461_s0 + $0xf0] sm:$0xff] }
   0x5   :  { %74 = vmatpush1.msra.mxu0 %v47_v7  ;;  %145 = vmatpush1.msra.mxu1 %v49_v8  ;;  %v40_v13 = vld [vmem:[%s1461_s0 + $0xc8] sm:$0xff]  ;;  %v42_v14 = vld [vmem:[%s1461_s0 + $0xd8] sm:$0xff]  ;;  %v39_v15 = vld [vmem:[%s1461_s0 + $0xc0] sm:$0xff] }
   0x6   :  { %75 = vmatprep.subr.mxu0 %v44_v9  ;;  %146 = vmatprep.subr.mxu1 %v46_v10  ;;  %v41_v16 = vld [vmem:[%s1461_s0 + $0xd0] sm:$0xff]  ;;  %v36_v17 = vld [vmem:[%s1461_s0 + $0xa8] sm:$0xff]  ;;  %v38_v18 = vld [vmem:[%s1461_s0 + $0xb8] sm:$0xff] }
   0x7   :  { %76 = vmatpush1.msra.mxu0 %v43_v11  ;;  %147 = vmatpush1.msra.mxu1 %v45_v12  ;;  %v35_v19 = vld [vmem:[%s1461_s0 + $0xa0] sm:$0xff]  ;;  %v37_v20 = vld [vmem:[%s1461_s0 + $0xb0] sm:$0xff]  ;;  %v32_v21 = vld [vmem:[%s1461_s0 + $0x88] sm:$0xff] }
   0x8   :  { %77 = vmatprep.subr.mxu0 %v40_v13  ;;  %148 = vmatprep.subr.mxu1 %v42_v14  ;;  %v34_v22 = vld [vmem:[%s1461_s0 + $0x98] sm:$0xff]  ;;  %v31_v23 = vld [vmem:[%s1461_s0 + $0x80] sm:$0xff]  ;;  %v33_v24 = vld [vmem:[%s1461_s0 + $0x90] sm:$0xff] }
   0x9   :  { %78 = vmatpush1.msra.mxu0 %v39_v15  ;;  %149 = vmatpush1.msra.mxu1 %v41_v16  ;;  %v28_v25 = vld [vmem:[%s1461_s0 + $0x68] sm:$0xff]  ;;  %v30_v26 = vld [vmem:[%s1461_s0 + $0x78] sm:$0xff]  ;;  %v27_v27 = vld [vmem:[%s1461_s0 + $0x60] sm:$0xff] }
   0xa   :  { %79 = vmatprep.subr.mxu0 %v36_v17  ;;  %150 = vmatprep.subr.mxu1 %v38_v18  ;;  %v29_v28 = vld [vmem:[%s1461_s0 + $0x70] sm:$0xff]  ;;  %v24_v29 = vld [vmem:[%s1461_s0 + $0x48] sm:$0xff]  ;;  %v26_v30 = vld [vmem:[%s1461_s0 + $0x58] sm:$0xff] }
   0xb   :  { %80 = vmatpush1.msra.mxu0 %v35_v19  ;;  %151 = vmatpush1.msra.mxu1 %v37_v20  ;;  %v23_v31 = vld [vmem:[%s1461_s0 + $0x40] sm:$0xff]  ;;  %v25_v32 = vld [vmem:[%s1461_s0 + $0x50] sm:$0xff]  ;;  %v20_v33 = vld [vmem:[%s1461_s0 + $0x28] sm:$0xff] }
   0xc   :  { %81 = vmatprep.subr.mxu0 %v32_v21  ;;  %152 = vmatprep.subr.mxu1 %v34_v22  ;;  %v22_v34 = vld [vmem:[%s1461_s0 + $0x38] sm:$0xff]  ;;  %v19_v35 = vld [vmem:[%s1461_s0 + $0x20] sm:$0xff]  ;;  %v21_v36 = vld [vmem:[%s1461_s0 + $0x30] sm:$0xff] }
   0xd   :  { %82 = vmatpush1.msra.mxu0 %v31_v23  ;;  %153 = vmatpush1.msra.mxu1 %v33_v24  ;;  %v16_v37 = vld [vmem:[%s1461_s0 + $0x8] sm:$0xff]  ;;  %v18_v38 = vld [vmem:[%s1461_s0 + $0x18] sm:$0xff]  ;;  %v15_v39 = vld [vmem:[%s1461_s0] sm:$0xff] }
   0xe   :  { %83 = vmatprep.subr.mxu0 %v28_v25  ;;  %154 = vmatprep.subr.mxu1 %v30_v26  ;;  %v17_v40 = vld [vmem:[%s1461_s0 + $0x10] sm:$0xff]  ;;  %v1062_v41 = vld [vmem:[%s1462_s1] sm:$0xff]  ;;  %v823_v42 = vld [vmem:[%s1461_s0 + $0x268] sm:$0xff] }
   0xf   :  { %84 = vmatpush1.msra.mxu0 %v27_v27  ;;  %155 = vmatpush1.msra.mxu1 %v29_v28  ;;  %v825_v43 = vld [vmem:[%s1461_s0 + $0x278] sm:$0xff]  ;;  %v822_v44 = vld [vmem:[%s1461_s0 + $0x260] sm:$0xff]  ;;  %v824_v45 = vld [vmem:[%s1461_s0 + $0x270] sm:$0xff] }
  0x10   :  { %85 = vmatprep.subr.mxu0 %v24_v29  ;;  %156 = vmatprep.subr.mxu1 %v26_v30  ;;  %v819_v46 = vld [vmem:[%s1461_s0 + $0x248] sm:$0xff]  ;;  %v821_v47 = vld [vmem:[%s1461_s0 + $0x258] sm:$0xff]  ;;  %v818_v48 = vld [vmem:[%s1461_s0 + $0x240] sm:$0xff] }
  0x11   :  { %86 = vmatpush1.msra.mxu0 %v23_v31  ;;  %157 = vmatpush1.msra.mxu1 %v25_v32  ;;  %v820_v49 = vld [vmem:[%s1461_s0 + $0x250] sm:$0xff]  ;;  %v815_v50 = vld [vmem:[%s1461_s0 + $0x228] sm:$0xff]  ;;  %v817_v51 = vld [vmem:[%s1461_s0 + $0x238] sm:$0xff] }
  0x12   :  { %87 = vmatprep.subr.mxu0 %v20_v33  ;;  %158 = vmatprep.subr.mxu1 %v22_v34  ;;  %v814_v52 = vld [vmem:[%s1461_s0 + $0x220] sm:$0xff]  ;;  %v816_v53 = vld [vmem:[%s1461_s0 + $0x230] sm:$0xff]  ;;  %v811_v54 = vld [vmem:[%s1461_s0 + $0x208] sm:$0xff] }
  0x13   :  { %88 = vmatpush1.msra.mxu0 %v19_v35  ;;  %159 = vmatpush1.msra.mxu1 %v21_v36  ;;  %v813_v55 = vld [vmem:[%s1461_s0 + $0x218] sm:$0xff]  ;;  %v810_v56 = vld [vmem:[%s1461_s0 + $0x200] sm:$0xff]  ;;  %v812_v57 = vld [vmem:[%s1461_s0 + $0x210] sm:$0xff] }
  0x14   :  { %89 = vmatprep.subr.mxu0 %v16_v37  ;;  %160 = vmatprep.subr.mxu1 %v18_v38  ;;  %v807_v58 = vld [vmem:[%s1461_s0 + $0x1e8] sm:$0xff]  ;;  %v809_v59 = vld [vmem:[%s1461_s0 + $0x1f8] sm:$0xff]  ;;  %v806_v60 = vld [vmem:[%s1461_s0 + $0x1e0] sm:$0xff] }
  0x15   :  { %90 = vmatpush1.msra.mxu0 %v15_v39  ;;  %161 = vmatpush1.msra.mxu1 %v17_v40  ;;  %v808_v61 = vld [vmem:[%s1461_s0 + $0x1f0] sm:$0xff]  ;;  %v803_v62 = vld [vmem:[%s1461_s0 + $0x1c8] sm:$0xff]  ;;  %v805_v63 = vld [vmem:[%s1461_s0 + $0x1d8] sm:$0xff] }
  0x16   :  { %784 = vmatmul.mubr.msk.f32.vlgmr.msra.gmra.mxu0 %vm55_vm0, %v1062_v41  ;;  %785 = vmatmul.mubr.msk.f32.vlgmr.msra.gmra.mxu1 %vm55_vm0, %v1062_v41  ;;  %v802_v0 = vld [vmem:[%s1461_s0 + $0x1c0] sm:$0xff]  ;;  %v804_v1 = vld [vmem:[%s1461_s0 + $0x1d0] sm:$0xff]  ;;  %v799_v2 = vld [vmem:[%s1461_s0 + $0x1a8] sm:$0xff] }
  0x17   :  { %254 = vmatprep.subr.mxu0 %v823_v42  ;;  %325 = vmatprep.subr.mxu1 %v825_v43  ;;  %v801_v4 = vld [vmem:[%s1461_s0 + $0x1b8] sm:$0xff]  ;;  %v798_v5 = vld [vmem:[%s1461_s0 + $0x1a0] sm:$0xff]  ;;  %v800_v6 = vld [vmem:[%s1461_s0 + $0x1b0] sm:$0xff] }
  0x18   :  { %255 = vmatpush1.msra.mxu0 %v822_v44  ;;  %326 = vmatpush1.msra.mxu1 %v824_v45  ;;  %v795_v7 = vld [vmem:[%s1461_s0 + $0x188] sm:$0xff]  ;;  %v797_v8 = vld [vmem:[%s1461_s0 + $0x198] sm:$0xff]  ;;  %v794_v9 = vld [vmem:[%s1461_s0 + $0x180] sm:$0xff] }
  0x19   :  { %256 = vmatprep.subr.mxu0 %v819_v46  ;;  %327 = vmatprep.subr.mxu1 %v821_v47  ;;  %v796_v10 = vld [vmem:[%s1461_s0 + $0x190] sm:$0xff]  ;;  %v791_v11 = vld [vmem:[%s1461_s0 + $0x168] sm:$0xff]  ;;  %v793_v12 = vld [vmem:[%s1461_s0 + $0x178] sm:$0xff] }
  0x1a   :  { %257 = vmatpush1.msra.mxu0 %v818_v48  ;;  %328 = vmatpush1.msra.mxu1 %v820_v49  ;;  %v790_v13 = vld [vmem:[%s1461_s0 + $0x160] sm:$0xff]  ;;  %v792_v14 = vld [vmem:[%s1461_s0 + $0x170] sm:$0xff]  ;;  %v787_v15 = vld [vmem:[%s1461_s0 + $0x148] sm:$0xff] }
  0x1b   :  { %258 = vmatprep.subr.mxu0 %v815_v50  ;;  %329 = vmatprep.subr.mxu1 %v817_v51  ;;  %v789_v16 = vld [vmem:[%s1461_s0 + $0x158] sm:$0xff]  ;;  %v786_v17 = vld [vmem:[%s1461_s0 + $0x140] sm:$0xff]  ;;  %v788_v18 = vld [vmem:[%s1461_s0 + $0x150] sm:$0xff] }
  0x1c   :  { %259 = vmatpush1.msra.mxu0 %v814_v52  ;;  %330 = vmatpush1.msra.mxu1 %v816_v53  ;;  %v865_v19 = vld [vmem:[%s1461_s0 + $0x3a8] sm:$0xff]  ;;  %v867_v20 = vld [vmem:[%s1461_s0 + $0x3b8] sm:$0xff]  ;;  %v864_v21 = vld [vmem:[%s1461_s0 + $0x3a0] sm:$0xff] }
  0x1d   :  { %260 = vmatprep.subr.mxu0 %v811_v54  ;;  %331 = vmatprep.subr.mxu1 %v813_v55  ;;  %v866_v22 = vld [vmem:[%s1461_s0 + $0x3b0] sm:$0xff]  ;;  %v861_v23 = vld [vmem:[%s1461_s0 + $0x388] sm:$0xff]  ;;  %v863_v24 = vld [vmem:[%s1461_s0 + $0x398] sm:$0xff] }
  0x1e   :  { %261 = vmatpush1.msra.mxu0 %v810_v56  ;;  %332 = vmatpush1.msra.mxu1 %v812_v57  ;;  %v860_v25 = vld [vmem:[%s1461_s0 + $0x380] sm:$0xff]  ;;  %v862_v26 = vld [vmem:[%s1461_s0 + $0x390] sm:$0xff]  ;;  %v857_v27 = vld [vmem:[%s1461_s0 + $0x368] sm:$0xff] }
  0x1f   :  { %262 = vmatprep.subr.mxu0 %v807_v58  ;;  %333 = vmatprep.subr.mxu1 %v809_v59  ;;  %v859_v28 = vld [vmem:[%s1461_s0 + $0x378] sm:$0xff]  ;;  %v856_v29 = vld [vmem:[%s1461_s0 + $0x360] sm:$0xff]  ;;  %v858_v30 = vld [vmem:[%s1461_s0 + $0x370] sm:$0xff] }
  0x20   :  { %263 = vmatpush1.msra.mxu0 %v806_v60  ;;  %334 = vmatpush1.msra.mxu1 %v808_v61  ;;  %v853_v31 = vld [vmem:[%s1461_s0 + $0x348] sm:$0xff]  ;;  %v855_v32 = vld [vmem:[%s1461_s0 + $0x358] sm:$0xff]  ;;  %v852_v33 = vld [vmem:[%s1461_s0 + $0x340] sm:$0xff] }
  0x21   :  { %264 = vmatprep.subr.mxu0 %v803_v62  ;;  %335 = vmatprep.subr.mxu1 %v805_v63  ;;  %v854_v34 = vld [vmem:[%s1461_s0 + $0x350] sm:$0xff]  ;;  %v849_v35 = vld [vmem:[%s1461_s0 + $0x328] sm:$0xff]  ;;  %v851_v36 = vld [vmem:[%s1461_s0 + $0x338] sm:$0xff] }
  0x22   :  { %265 = vmatpush1.msra.mxu0 %v802_v0  ;;  %336 = vmatpush1.msra.mxu1 %v804_v1  ;;  %v848_v37 = vld [vmem:[%s1461_s0 + $0x320] sm:$0xff]  ;;  %v850_v38 = vld [vmem:[%s1461_s0 + $0x330] sm:$0xff]  ;;  %v845_v39 = vld [vmem:[%s1461_s0 + $0x308] sm:$0xff] }
  0x23   :  { %266 = vmatprep.subr.mxu0 %v799_v2  ;;  %337 = vmatprep.subr.mxu1 %v801_v4  ;;  %v847_v40 = vld [vmem:[%s1461_s0 + $0x318] sm:$0xff]  ;;  %v844_v42 = vld [vmem:[%s1461_s0 + $0x300] sm:$0xff]  ;;  %v846_v43 = vld [vmem:[%s1461_s0 + $0x310] sm:$0xff] }
  0x24   :  { %267 = vmatpush1.msra.mxu0 %v798_v5  ;;  %338 = vmatpush1.msra.mxu1 %v800_v6  ;;  %v841_v44 = vld [vmem:[%s1461_s0 + $0x2e8] sm:$0xff]  ;;  %v843_v45 = vld [vmem:[%s1461_s0 + $0x2f8] sm:$0xff]  ;;  %v840_v46 = vld [vmem:[%s1461_s0 + $0x2e0] sm:$0xff] }
  0x25   :  { %268 = vmatprep.subr.mxu0 %v795_v7  ;;  %339 = vmatprep.subr.mxu1 %v797_v8  ;;  %v842_v47 = vld [vmem:[%s1461_s0 + $0x2f0] sm:$0xff]  ;;  %v837_v48 = vld [vmem:[%s1461_s0 + $0x2c8] sm:$0xff]  ;;  %v839_v49 = vld [vmem:[%s1461_s0 + $0x2d8] sm:$0xff] }
  0x26   :  { %269 = vmatpush1.msra.mxu0 %v794_v9  ;;  %340 = vmatpush1.msra.mxu1 %v796_v10  ;;  %v836_v50 = vld [vmem:[%s1461_s0 + $0x2c0] sm:$0xff]  ;;  %v838_v51 = vld [vmem:[%s1461_s0 + $0x2d0] sm:$0xff]  ;;  %v833_v52 = vld [vmem:[%s1461_s0 + $0x2a8] sm:$0xff] }
  0x27   :  { %270 = vmatprep.subr.mxu0 %v791_v11  ;;  %341 = vmatprep.subr.mxu1 %v793_v12  ;;  %v835_v53 = vld [vmem:[%s1461_s0 + $0x2b8] sm:$0xff]  ;;  %v832_v54 = vld [vmem:[%s1461_s0 + $0x2a0] sm:$0xff]  ;;  %v834_v55 = vld [vmem:[%s1461_s0 + $0x2b0] sm:$0xff] }
  0x28   :  { %271 = vmatpush1.msra.mxu0 %v790_v13  ;;  %342 = vmatpush1.msra.mxu1 %v792_v14  ;;  %v829_v56 = vld [vmem:[%s1461_s0 + $0x288] sm:$0xff]  ;;  %v831_v57 = vld [vmem:[%s1461_s0 + $0x298] sm:$0xff]  ;;  %v828_v58 = vld [vmem:[%s1461_s0 + $0x280] sm:$0xff] }
  0x29   :  { %272 = vmatprep.subr.mxu0 %v787_v15  ;;  %343 = vmatprep.subr.mxu1 %v789_v16  ;;  %v830_v59 = vld [vmem:[%s1461_s0 + $0x290] sm:$0xff]  ;;  %v907_v60 = vld [vmem:[%s1461_s0 + $0x4e8] sm:$0xff]  ;;  %v909_v61 = vld [vmem:[%s1461_s0 + $0x4f8] sm:$0xff] }
  0x2a   :  { %273 = vmatpush1.msra.mxu0 %v786_v17  ;;  %306 = vmatprep.mubr.f32.mxu0 %v915_v3  ;;  %v906_v62 = vld [vmem:[%s1461_s0 + $0x4e0] sm:$0xff]  ;;  %v908_v63 = vld [vmem:[%s1461_s0 + $0x4f0] sm:$0xff]  ;;  %v903_v0 = vld [vmem:[%s1461_s0 + $0x4c8] sm:$0xff] }
  0x2b   :  { %344 = vmatpush1.msra.mxu1 %v788_v18  ;;  %377 = vmatprep.mubr.f32.mxu1 %v915_v3  ;;  %v905_v1 = vld [vmem:[%s1461_s0 + $0x4d8] sm:$0xff]  ;;  %v902_v2 = vld [vmem:[%s1461_s0 + $0x4c0] sm:$0xff]  ;;  %v904_v4 = vld [vmem:[%s1461_s0 + $0x4d0] sm:$0xff] }
  0x2c   :  { %826 = vmatmul.mubr.msk.f32.vlgmr.msra.gmra.mxu0 %vm55_vm0, %v1062_v41  ;;  %827 = vmatmul.mubr.msk.f32.vlgmr.msra.gmra.mxu1 %vm55_vm0, %v1062_v41  ;;  %v899_v5 = vld [vmem:[%s1461_s0 + $0x4a8] sm:$0xff]  ;;  %v901_v6 = vld [vmem:[%s1461_s0 + $0x4b8] sm:$0xff]  ;;  %v898_v7 = vld [vmem:[%s1461_s0 + $0x4a0] sm:$0xff] }
  0x2d   :  { %437 = vmatprep.subr.mxu0 %v865_v19  ;;  %508 = vmatprep.subr.mxu1 %v867_v20  ;;  %v900_v8 = vld [vmem:[%s1461_s0 + $0x4b0] sm:$0xff]  ;;  %v895_v9 = vld [vmem:[%s1461_s0 + $0x488] sm:$0xff]  ;;  %v897_v10 = vld [vmem:[%s1461_s0 + $0x498] sm:$0xff] }
  0x2e   :  { %438 = vmatpush1.msra.mxu0 %v864_v21  ;;  %509 = vmatpush1.msra.mxu1 %v866_v22  ;;  %v894_v11 = vld [vmem:[%s1461_s0 + $0x480] sm:$0xff]  ;;  %v896_v12 = vld [vmem:[%s1461_s0 + $0x490] sm:$0xff]  ;;  %v891_v13 = vld [vmem:[%s1461_s0 + $0x468] sm:$0xff] }
  0x2f   :  { %439 = vmatprep.subr.mxu0 %v861_v23  ;;  %510 = vmatprep.subr.mxu1 %v863_v24  ;;  %v893_v14 = vld [vmem:[%s1461_s0 + $0x478] sm:$0xff]  ;;  %v890_v15 = vld [vmem:[%s1461_s0 + $0x460] sm:$0xff]  ;;  %v892_v16 = vld [vmem:[%s1461_s0 + $0x470] sm:$0xff] }
  0x30   :  { %440 = vmatpush1.msra.mxu0 %v860_v25  ;;  %511 = vmatpush1.msra.mxu1 %v862_v26  ;;  %v887_v17 = vld [vmem:[%s1461_s0 + $0x448] sm:$0xff]  ;;  %v889_v18 = vld [vmem:[%s1461_s0 + $0x458] sm:$0xff]  ;;  %v886_v19 = vld [vmem:[%s1461_s0 + $0x440] sm:$0xff] }
  0x31   :  { %441 = vmatprep.subr.mxu0 %v857_v27  ;;  %512 = vmatprep.subr.mxu1 %v859_v28  ;;  %v888_v20 = vld [vmem:[%s1461_s0 + $0x450] sm:$0xff]  ;;  %v883_v21 = vld [vmem:[%s1461_s0 + $0x428] sm:$0xff]  ;;  %v885_v22 = vld [vmem:[%s1461_s0 + $0x438] sm:$0xff] }
  0x32   :  { %442 = vmatpush1.msra.mxu0 %v856_v29  ;;  %513 = vmatpush1.msra.mxu1 %v858_v30  ;;  %v882_v23 = vld [vmem:[%s1461_s0 + $0x420] sm:$0xff]  ;;  %v884_v24 = vld [vmem:[%s1461_s0 + $0x430] sm:$0xff]  ;;  %v879_v25 = vld [vmem:[%s1461_s0 + $0x408] sm:$0xff] }
  0x33   :  { %443 = vmatprep.subr.mxu0 %v853_v31  ;;  %514 = vmatprep.subr.mxu1 %v855_v32  ;;  %v881_v26 = vld [vmem:[%s1461_s0 + $0x418] sm:$0xff]  ;;  %v878_v27 = vld [vmem:[%s1461_s0 + $0x400] sm:$0xff]  ;;  %v880_v28 = vld [vmem:[%s1461_s0 + $0x410] sm:$0xff] }
  0x34   :  { %444 = vmatpush1.msra.mxu0 %v852_v33  ;;  %515 = vmatpush1.msra.mxu1 %v854_v34  ;;  %v875_v29 = vld [vmem:[%s1461_s0 + $0x3e8] sm:$0xff]  ;;  %v877_v30 = vld [vmem:[%s1461_s0 + $0x3f8] sm:$0xff]  ;;  %v874_v31 = vld [vmem:[%s1461_s0 + $0x3e0] sm:$0xff] }
  0x35   :  { %445 = vmatprep.subr.mxu0 %v849_v35  ;;  %516 = vmatprep.subr.mxu1 %v851_v36  ;;  %v876_v32 = vld [vmem:[%s1461_s0 + $0x3f0] sm:$0xff]  ;;  %v871_v33 = vld [vmem:[%s1461_s0 + $0x3c8] sm:$0xff]  ;;  %v873_v34 = vld [vmem:[%s1461_s0 + $0x3d8] sm:$0xff] }
  0x36   :  { %446 = vmatpush1.msra.mxu0 %v848_v37  ;;  %517 = vmatpush1.msra.mxu1 %v850_v38  ;;  %v870_v35 = vld [vmem:[%s1461_s0 + $0x3c0] sm:$0xff]  ;;  %v872_v36 = vld [vmem:[%s1461_s0 + $0x3d0] sm:$0xff]  ;;  %v916_v38 = vmov 0  }
  0x37   :  { %447 = vmatprep.subr.mxu0 %v845_v39  ;;  %518 = vmatprep.subr.mxu1 %v847_v40  ;;  %v762_v37 = vld [vmem:[%s1463_s2] sm:$0xff] }
  0x38   :  { %448 = vmatpush1.msra.mxu0 %v844_v42  ;;  %519 = vmatpush1.msra.mxu1 %v846_v43 }
  0x39   :  { %449 = vmatprep.subr.mxu0 %v841_v44  ;;  %520 = vmatprep.subr.mxu1 %v843_v45 }
  0x3a   :  { %450 = vmatpush1.msra.mxu0 %v840_v46  ;;  %521 = vmatpush1.msra.mxu1 %v842_v47 }
  0x3b   :  { %451 = vmatprep.subr.mxu0 %v837_v48  ;;  %522 = vmatprep.subr.mxu1 %v839_v49 }
  0x3c   :  { %452 = vmatpush1.msra.mxu0 %v836_v50  ;;  %523 = vmatpush1.msra.mxu1 %v838_v51 }
  0x3d   :  { %453 = vmatprep.subr.mxu0 %v833_v52  ;;  %524 = vmatprep.subr.mxu1 %v835_v53 }
  0x3e   :  { %454 = vmatpush1.msra.mxu0 %v832_v54  ;;  %525 = vmatpush1.msra.mxu1 %v834_v55 }
  0x3f   :  { %455 = vmatprep.subr.mxu0 %v829_v56  ;;  %526 = vmatprep.subr.mxu1 %v831_v57 }
  0x40   :  { %456 = vmatpush1.msra.mxu0 %v828_v58  ;;  %489 = vmatprep.mubr.f32.mxu0 %v915_v3 }
  0x41   :  { %527 = vmatpush1.msra.mxu1 %v830_v59  ;;  %560 = vmatprep.mubr.f32.mxu1 %v915_v3 }
  0x42   :  { %868 = vmatmul.mubr.msk.f32.vlgmr.msra.gmra.mxu0 %vm55_vm0, %v1062_v41  ;;  %869 = vmatmul.mubr.msk.f32.vlgmr.msra.gmra.mxu1 %vm55_vm0, %v1062_v41 }
  0x43   :  { %620 = vmatprep.subr.mxu0 %v907_v60  ;;  %691 = vmatprep.subr.mxu1 %v909_v61 }
  0x44   :  { %621 = vmatpush1.msra.mxu0 %v906_v62  ;;  %692 = vmatpush1.msra.mxu1 %v908_v63 }
  0x45   :  { %622 = vmatprep.subr.mxu0 %v903_v0  ;;  %693 = vmatprep.subr.mxu1 %v905_v1 }
  0x46   :  { %623 = vmatpush1.msra.mxu0 %v902_v2  ;;  %694 = vmatpush1.msra.mxu1 %v904_v4 }
  0x47   :  { %624 = vmatprep.subr.mxu0 %v899_v5  ;;  %695 = vmatprep.subr.mxu1 %v901_v6 }
  0x48   :  { %625 = vmatpush1.msra.mxu0 %v898_v7  ;;  %696 = vmatpush1.msra.mxu1 %v900_v8 }
  0x49   :  { %626 = vmatprep.subr.mxu0 %v895_v9  ;;  %697 = vmatprep.subr.mxu1 %v897_v10 }
  0x4a   :  { %627 = vmatpush1.msra.mxu0 %v894_v11  ;;  %698 = vmatpush1.msra.mxu1 %v896_v12 }
  0x4b   :  { %628 = vmatprep.subr.mxu0 %v891_v13  ;;  %699 = vmatprep.subr.mxu1 %v893_v14 }
  0x4c   :  { %629 = vmatpush1.msra.mxu0 %v890_v15  ;;  %700 = vmatpush1.msra.mxu1 %v892_v16 }
  0x4d   :  { %630 = vmatprep.subr.mxu0 %v887_v17  ;;  %701 = vmatprep.subr.mxu1 %v889_v18 }
  0x4e   :  { %631 = vmatpush1.msra.mxu0 %v886_v19  ;;  %702 = vmatpush1.msra.mxu1 %v888_v20 }
  0x4f   :  { %632 = vmatprep.subr.mxu0 %v883_v21  ;;  %703 = vmatprep.subr.mxu1 %v885_v22 }
  0x50   :  { %633 = vmatpush1.msra.mxu0 %v882_v23  ;;  %704 = vmatpush1.msra.mxu1 %v884_v24 }
  0x51   :  { %634 = vmatprep.subr.mxu0 %v879_v25  ;;  %705 = vmatprep.subr.mxu1 %v881_v26 }
  0x52   :  { %635 = vmatpush1.msra.mxu0 %v878_v27  ;;  %706 = vmatpush1.msra.mxu1 %v880_v28 }
  0x53   :  { %636 = vmatprep.subr.mxu0 %v875_v29  ;;  %707 = vmatprep.subr.mxu1 %v877_v30 }
  0x54   :  { %637 = vmatpush1.msra.mxu0 %v874_v31  ;;  %708 = vmatpush1.msra.mxu1 %v876_v32 }
  0x55   :  { %638 = vmatprep.subr.mxu0 %v871_v33  ;;  %709 = vmatprep.subr.mxu1 %v873_v34 }
  0x56   :  { %639 = vmatpush1.msra.mxu0 %v870_v35  ;;  %672 = vmatprep.mubr.f32.mxu0 %v915_v3 }
  0x57   :  { %710 = vmatpush1.msra.mxu1 %v872_v36  ;;  %743 = vmatprep.mubr.f32.mxu1 %v915_v3 }
  0x58   :  { %910 = vmatmul.mubr.msk.f32.vlgmr.msra.gmra.mxu0 %vm55_vm0, %v1062_v41  ;;  %911 = vmatmul.mubr.msk.f32.vlgmr.msra.gmra.mxu1 %vm55_vm0, %v1062_v41 }
  0x59   :  { %914 = vset.pattern.permute.xlu0 %v916_v38 }
  0x5a   :  { %765 = vperm.xlu0 %914, %v762_v37  }
  0xd5   :  { %v766_v56 = vpop.permute.xlu0 %765 }
  0xd6   :  { %v125_v39 = vpop.f32.mrf.mxu0  ;;  %v196_v40 = vpop.f32.mrf.mxu1 }
  0xd8   :  { %v127_v42 = vpop.f32.mrf.mxu0  ;;  %v198_v43 = vpop.f32.mrf.mxu1 }
  0xec   :  { %v308_v44 = vpop.f32.mrf.mxu0  ;;  %v379_v45 = vpop.f32.mrf.mxu1 }
  0xed   :  { %v750_v53 = vmax.f32 %v125_v39, %v308_v44  ;;  %v752_v54 = vmax.f32 %v196_v40, %v379_v45 }
  0xee   :  { %v310_v3 = vpop.f32.mrf.mxu0  ;;  %v381_v46 = vpop.f32.mrf.mxu1 }
  0xef   :  { %v751_v57 = vmax.f32 %v127_v42, %v310_v3  ;;  %v753_v58 = vmax.f32 %v198_v43, %v381_v46 }
 0x102   :  { %v491_v47 = vpop.f32.mrf.mxu0  ;;  %v562_v48 = vpop.f32.mrf.mxu1 }
 0x104   :  { %v493_v49 = vpop.f32.mrf.mxu0  ;;  %v564_v50 = vpop.f32.mrf.mxu1 }
 0x118   :  { %v674_v51 = vpop.f32.mrf.mxu0  ;;  %v745_v52 = vpop.f32.mrf.mxu1 }
 0x119   :  { %v754_v41 = vmax.f32 %v491_v47, %v674_v51  ;;  %v756_v55 = vmax.f32 %v562_v48, %v745_v52 }
 0x11a   :  { %v676_v59 = vpop.f32.mrf.mxu0  ;;  %v747_v60 = vpop.f32.mrf.mxu1 }
 0x11b   :  { %v758_v61 = vmax.f32 %v750_v53, %v754_v41  ;;  %v760_v62 = vmax.f32 %v752_v54, %v756_v55  ;;  %v755_v63 = vmax.f32 %v493_v49, %v676_v59  ;;  %v757_v0 = vmax.f32 %v564_v50, %v747_v60 }
 0x11d   :  { %v759_v1 = vmax.f32 %v751_v57, %v755_v63  ;;  %v761_v2 = vmax.f32 %v753_v58, %v757_v0  ;;  %v768_v4 = vadd.f32 %v766_v56, %v758_v61  ;;  %v770_v5 = vadd.f32 %v766_v56, %v760_v62 }
 0x11f   :  { %v769_v6 = vadd.f32 %v766_v56, %v759_v1  ;;  %v771_v7 = vadd.f32 %v766_v56, %v761_v2  ;;  %v772_v8 = vmax.f32 %v768_v4, 0.0  ;;  %v774_v9 = vmax.f32 %v770_v5, 0.0 }
 0x121   :  { %v773_v10 = vmax.f32 %v769_v6, 0.0  ;;  %v775_v11 = vmax.f32 %v771_v7, 0.0  ;;  %776 = vst [vmem:[%s1464_s3] sm:$0xff] %v772_v8  ;;  %778 = vst [vmem:[%s1464_s3 + $0x10] sm:$0xff] %v774_v9 }
 0x123   :  { %777 = vst [vmem:[%s1464_s3 + $0x8] sm:$0xff] %v773_v10  ;;  %779 = vst [vmem:[%s1464_s3 + $0x18] sm:$0xff] %v775_v11 }

// kernel: net_forward.4
= control target key start
LH: loop header
LB: loop body
LE: loop exit
PB: predicated region body
PF: predicated region fallthrough
CT: control target
= control target key end

     0   :  { %v500_v0 = vmov 0.0   ;;  %vm37_vm0 = vcmask 195584   ;;  %s870_s0 = inlined_call_operand.vmem [shape: f32[4,152,128], index: 0, kind: input, shape index: {}]   ;;  %s871_s1 = inlined_call_operand.vmem [shape: f32[16,152], index: 1, kind: input, shape index: {}]   ;;  %s872_s2 = inlined_call_operand.vmem [shape: f32[16,1], index: 2, kind: input, shape index: {}]   ;;  %s873_s3 = inlined_call_operand.vmem [shape: f32[16,128], index: 3, kind: output, shape index: {}]  }
   0x1   :  { %44 = vmatprep.subr.mxu0 %v500_v0  ;;  %139 = vmatprep.subr.mxu1 %v500_v0  ;;  %v33_v1 = vld [vmem:[%s870_s0 + $0x78] sm:$0xff]  ;;  %v449_v2 = vld [vmem:[%s870_s0 + $0x110] sm:$0xff]  ;;  %v448_v4 = vld [vmem:[%s870_s0 + $0x108] sm:$0xff] }
   0x2   :  { %v32_v3 = vld [vmem:[%s870_s0 + $0x70] sm:$0xff]  ;;  %45 = vmatpush1.msra.mxu0 %v33_v1  ;;  %140 = vmatpush1.msra.mxu1 %v449_v2  ;;  %v31_v5 = vld [vmem:[%s870_s0 + $0x68] sm:$0xff]  ;;  %v447_v6 = vld [vmem:[%s870_s0 + $0x100] sm:$0xff] }
   0x3   :  { %46 = vmatprep.subr.mxu0 %v500_v0  ;;  %141 = vmatprep.subr.mxu1 %v500_v0  ;;  %v30_v7 = vld [vmem:[%s870_s0 + $0x60] sm:$0xff]  ;;  %v446_v8 = vld [vmem:[%s870_s0 + $0xf8] sm:$0xff]  ;;  %v445_v10 = vld [vmem:[%s870_s0 + $0xf0] sm:$0xff] }
   0x4   :  { %47 = vmatpush1.msra.mxu0 %v32_v3  ;;  %142 = vmatpush1.msra.mxu1 %v448_v4  ;;  %v29_v9 = vld [vmem:[%s870_s0 + $0x58] sm:$0xff]  ;;  %v28_v11 = vld [vmem:[%s870_s0 + $0x50] sm:$0xff]  ;;  %v444_v12 = vld [vmem:[%s870_s0 + $0xe8] sm:$0xff] }
   0x5   :  { %48 = vmatprep.subr.mxu0 %v500_v0  ;;  %143 = vmatprep.subr.mxu1 %v500_v0  ;;  %v27_v13 = vld [vmem:[%s870_s0 + $0x48] sm:$0xff]  ;;  %v443_v14 = vld [vmem:[%s870_s0 + $0xe0] sm:$0xff]  ;;  %v442_v16 = vld [vmem:[%s870_s0 + $0xd8] sm:$0xff] }
   0x6   :  { %49 = vmatpush1.msra.mxu0 %v31_v5  ;;  %144 = vmatpush1.msra.mxu1 %v447_v6  ;;  %v26_v15 = vld [vmem:[%s870_s0 + $0x40] sm:$0xff]  ;;  %v25_v17 = vld [vmem:[%s870_s0 + $0x38] sm:$0xff]  ;;  %v441_v18 = vld [vmem:[%s870_s0 + $0xd0] sm:$0xff] }
   0x7   :  { %50 = vmatprep.subr.mxu0 %v500_v0  ;;  %145 = vmatprep.subr.mxu1 %v500_v0  ;;  %v24_v19 = vld [vmem:[%s870_s0 + $0x30] sm:$0xff]  ;;  %v440_v20 = vld [vmem:[%s870_s0 + $0xc8] sm:$0xff]  ;;  %v439_v22 = vld [vmem:[%s870_s0 + $0xc0] sm:$0xff] }
   0x8   :  { %51 = vmatpush1.msra.mxu0 %v30_v7  ;;  %146 = vmatpush1.msra.mxu1 %v446_v8  ;;  %v23_v21 = vld [vmem:[%s870_s0 + $0x28] sm:$0xff]  ;;  %v22_v23 = vld [vmem:[%s870_s0 + $0x20] sm:$0xff]  ;;  %v438_v24 = vld [vmem:[%s870_s0 + $0xb8] sm:$0xff] }
   0x9   :  { %52 = vmatprep.subr.mxu0 %v500_v0  ;;  %147 = vmatprep.subr.mxu1 %v500_v0  ;;  %v21_v25 = vld [vmem:[%s870_s0 + $0x18] sm:$0xff]  ;;  %v437_v26 = vld [vmem:[%s870_s0 + $0xb0] sm:$0xff]  ;;  %v436_v28 = vld [vmem:[%s870_s0 + $0xa8] sm:$0xff] }
   0xa   :  { %53 = vmatpush1.msra.mxu0 %v29_v9  ;;  %148 = vmatpush1.msra.mxu1 %v445_v10  ;;  %v20_v27 = vld [vmem:[%s870_s0 + $0x10] sm:$0xff]  ;;  %v19_v29 = vld [vmem:[%s870_s0 + $0x8] sm:$0xff]  ;;  %v435_v30 = vld [vmem:[%s870_s0 + $0xa0] sm:$0xff] }
   0xb   :  { %54 = vmatprep.subr.mxu0 %v500_v0  ;;  %149 = vmatprep.subr.mxu1 %v500_v0  ;;  %v18_v31 = vld [vmem:[%s870_s0] sm:$0xff]  ;;  %v434_v32 = vld [vmem:[%s870_s0 + $0x98] sm:$0xff]  ;;  %v36_v33 = vld [vmem:[%s870_s0 + $0x90] sm:$0xff] }
   0xc   :  { %55 = vmatpush1.msra.mxu0 %v28_v11  ;;  %150 = vmatpush1.msra.mxu1 %v444_v12  ;;  %v452_v34 = vld [vmem:[%s870_s0 + $0x128] sm:$0xff]  ;;  %v451_v36 = vld [vmem:[%s870_s0 + $0x120] sm:$0xff]  ;;  %v450_v39 = vld [vmem:[%s870_s0 + $0x118] sm:$0xff] }
   0xd   :  { %56 = vmatprep.subr.mxu0 %v500_v0  ;;  %151 = vmatprep.subr.mxu1 %v500_v0  ;;  %v35_v35 = vld [vmem:[%s870_s0 + $0x88] sm:$0xff]  ;;  %v34_v37 = vld [vmem:[%s870_s0 + $0x80] sm:$0xff]  ;;  %v490_v44 = vld [vmem:[%s870_s0 + $0x238] sm:$0xff] }
   0xe   :  { %57 = vmatpush1.msra.mxu0 %v27_v13  ;;  %152 = vmatpush1.msra.mxu1 %v443_v14  ;;  %v672_v38 = vld [vmem:[%s871_s1 + $0x8] sm:$0xff]  ;;  %v682_v40 = vld [vmem:[%s871_s1] sm:$0xff]  ;;  %v468_v45 = vld [vmem:[%s870_s0 + $0x198] sm:$0xff] }
   0xf   :  { %58 = vmatprep.subr.mxu0 %v500_v0  ;;  %153 = vmatprep.subr.mxu1 %v500_v0  ;;  %v470_v41 = vld [vmem:[%s870_s0 + $0x1a8] sm:$0xff]  ;;  %v491_v42 = vld [vmem:[%s870_s0 + $0x240] sm:$0xff]  ;;  %v489_v46 = vld [vmem:[%s870_s0 + $0x230] sm:$0xff] }
  0x10   :  { %59 = vmatpush1.msra.mxu0 %v26_v15  ;;  %154 = vmatpush1.msra.mxu1 %v442_v16  ;;  %v469_v43 = vld [vmem:[%s870_s0 + $0x1a0] sm:$0xff]  ;;  %v467_v47 = vld [vmem:[%s870_s0 + $0x190] sm:$0xff]  ;;  %v488_v48 = vld [vmem:[%s870_s0 + $0x228] sm:$0xff] }
  0x11   :  { %60 = vmatprep.subr.mxu0 %v500_v0  ;;  %155 = vmatprep.subr.mxu1 %v500_v0  ;;  %v466_v49 = vld [vmem:[%s870_s0 + $0x188] sm:$0xff]  ;;  %v487_v50 = vld [vmem:[%s870_s0 + $0x220] sm:$0xff]  ;;  %v486_v52 = vld [vmem:[%s870_s0 + $0x218] sm:$0xff] }
  0x12   :  { %61 = vmatpush1.msra.mxu0 %v25_v17  ;;  %156 = vmatpush1.msra.mxu1 %v441_v18  ;;  %v465_v51 = vld [vmem:[%s870_s0 + $0x180] sm:$0xff]  ;;  %v464_v53 = vld [vmem:[%s870_s0 + $0x178] sm:$0xff]  ;;  %v485_v54 = vld [vmem:[%s870_s0 + $0x210] sm:$0xff] }
  0x13   :  { %62 = vmatprep.subr.mxu0 %v500_v0  ;;  %157 = vmatprep.subr.mxu1 %v500_v0  ;;  %v463_v55 = vld [vmem:[%s870_s0 + $0x170] sm:$0xff]  ;;  %v484_v56 = vld [vmem:[%s870_s0 + $0x208] sm:$0xff]  ;;  %v483_v58 = vld [vmem:[%s870_s0 + $0x200] sm:$0xff] }
  0x14   :  { %63 = vmatpush1.msra.mxu0 %v24_v19  ;;  %158 = vmatpush1.msra.mxu1 %v440_v20  ;;  %v462_v57 = vld [vmem:[%s870_s0 + $0x168] sm:$0xff]  ;;  %v461_v59 = vld [vmem:[%s870_s0 + $0x160] sm:$0xff]  ;;  %v482_v60 = vld [vmem:[%s870_s0 + $0x1f8] sm:$0xff] }
  0x15   :  { %64 = vmatprep.subr.mxu0 %v500_v0  ;;  %159 = vmatprep.subr.mxu1 %v500_v0  ;;  %v460_v61 = vld [vmem:[%s870_s0 + $0x158] sm:$0xff]  ;;  %v481_v62 = vld [vmem:[%s870_s0 + $0x1f0] sm:$0xff]  ;;  %v480_v1 = vld [vmem:[%s870_s0 + $0x1e8] sm:$0xff] }
  0x16   :  { %65 = vmatpush1.msra.mxu0 %v23_v21  ;;  %160 = vmatpush1.msra.mxu1 %v439_v22  ;;  %v459_v63 = vld [vmem:[%s870_s0 + $0x150] sm:$0xff]  ;;  %v458_v2 = vld [vmem:[%s870_s0 + $0x148] sm:$0xff]  ;;  %v479_v3 = vld [vmem:[%s870_s0 + $0x1e0] sm:$0xff] }
  0x17   :  { %66 = vmatprep.subr.mxu0 %v500_v0  ;;  %161 = vmatprep.subr.mxu1 %v500_v0  ;;  %v457_v4 = vld [vmem:[%s870_s0 + $0x140] sm:$0xff]  ;;  %v478_v5 = vld [vmem:[%s870_s0 + $0x1d8] sm:$0xff]  ;;  %v477_v7 = vld [vmem:[%s870_s0 + $0x1d0] sm:$0xff] }
  0x18   :  { %67 = vmatpush1.msra.mxu0 %v22_v23  ;;  %162 = vmatpush1.msra.mxu1 %v438_v24  ;;  %v456_v6 = vld [vmem:[%s870_s0 + $0x138] sm:$0xff]  ;;  %v455_v9 = vld [vmem:[%s870_s0 + $0x130] sm:$0xff]  ;;  %v476_v10 = vld [vmem:[%s870_s0 + $0x1c8] sm:$0xff] }
  0x19   :  { %68 = vmatprep.subr.mxu0 %v500_v0  ;;  %163 = vmatprep.subr.mxu1 %v500_v0  ;;  %v17_v8 = vld [vmem:[%s871_s1 + $0x18] sm:$0xff]  ;;  %v16_v11 = vld [vmem:[%s871_s1 + $0x10] sm:$0xff]  ;;  %v473_v12 = vld [vmem:[%s870_s0 + $0x1c0] sm:$0xff] }
  0x1a   :  { %69 = vmatpush1.msra.mxu0 %v21_v25  ;;  %164 = vmatpush1.msra.mxu1 %v437_v26  ;;  %v494_v13 = vld [vmem:[%s870_s0 + $0x258] sm:$0xff]  ;;  %v493_v15 = vld [vmem:[%s870_s0 + $0x250] sm:$0xff]  ;;  %v492_v17 = vld [vmem:[%s870_s0 + $0x248] sm:$0xff] }
  0x1b   :  { %70 = vmatprep.subr.mxu0 %v500_v0  ;;  %165 = vmatprep.subr.mxu1 %v500_v0  ;;  %v472_v14 = vld [vmem:[%s870_s0 + $0x1b8] sm:$0xff]  ;;  %v471_v16 = vld [vmem:[%s870_s0 + $0x1b0] sm:$0xff]  ;;  %v410_v18 = vld [vmem:[%s872_s2] sm:$0xff] }
  0x1c   :  { %71 = vmatpush1.msra.mxu0 %v20_v27  ;;  %166 = vmatpush1.msra.mxu1 %v436_v28  ;;  %v411_v19 = vld [vmem:[%s872_s2 + $0x8] sm:$0xff] }
  0x1d   :  { %72 = vmatprep.subr.mxu0 %v500_v0  ;;  %167 = vmatprep.subr.mxu1 %v500_v0 }
  0x1e   :  { %73 = vmatpush1.msra.mxu0 %v19_v29  ;;  %168 = vmatpush1.msra.mxu1 %v435_v30 }
  0x1f   :  { %74 = vmatprep.subr.mxu0 %v500_v0  ;;  %169 = vmatprep.subr.mxu1 %v500_v0 }
  0x20   :  { %75 = vmatpush1.msra.mxu0 %v18_v31  ;;  %170 = vmatpush1.msra.mxu1 %v434_v32 }
  0x21   :  { %102 = vmatprep.subr.mxu0 %v500_v0  ;;  %197 = vmatprep.subr.mxu1 %v500_v0 }
  0x22   :  { %103 = vmatpush2.msra.mxu0 %v36_v33  ;;  %198 = vmatpush2.msra.mxu1 %v452_v34 }
  0x23   :  { %104 = vmatprep.subr.mxu0 %v500_v0  ;;  %199 = vmatprep.subr.mxu1 %v500_v0 }
  0x24   :  { %105 = vmatpush2.msra.mxu0 %v35_v35  ;;  %200 = vmatpush2.msra.mxu1 %v451_v36 }
  0x25   :  { %106 = vmatprep.subr.mxu0 %v500_v0  ;;  %201 = vmatprep.subr.mxu1 %v500_v0 }
  0x26   :  { %107 = vmatpush2.msra.mxu0 %v34_v37  ;;  %432 = vmatprep.mubr.msk.f32.mxu0 %vm37_vm0, %v672_v38 }
  0x27   :  { %202 = vmatpush2.msra.mxu1 %v450_v39  ;;  %453 = vmatprep.mubr.msk.f32.mxu1 %vm37_vm0, %v672_v38 }
  0x28   :  { %109 = vmatmul.mubr.f32.vlgmr.msra.gmra.mxu0 %v682_v40  ;;  %204 = vmatmul.mubr.f32.vlgmr.msra.gmra.mxu1 %v682_v40 }
  0x29   :  { %234 = vmatprep.subr.mxu0 %v500_v0  ;;  %329 = vmatprep.subr.mxu1 %v500_v0 }
  0x2a   :  { %235 = vmatpush1.msra.mxu0 %v470_v41  ;;  %330 = vmatpush1.msra.mxu1 %v491_v42 }
  0x2b   :  { %236 = vmatprep.subr.mxu0 %v500_v0  ;;  %331 = vmatprep.subr.mxu1 %v500_v0 }
  0x2c   :  { %237 = vmatpush1.msra.mxu0 %v469_v43  ;;  %332 = vmatpush1.msra.mxu1 %v490_v44 }
  0x2d   :  { %238 = vmatprep.subr.mxu0 %v500_v0  ;;  %333 = vmatprep.subr.mxu1 %v500_v0 }
  0x2e   :  { %239 = vmatpush1.msra.mxu0 %v468_v45  ;;  %334 = vmatpush1.msra.mxu1 %v489_v46 }
  0x2f   :  { %240 = vmatprep.subr.mxu0 %v500_v0  ;;  %335 = vmatprep.subr.mxu1 %v500_v0 }
  0x30   :  { %241 = vmatpush1.msra.mxu0 %v467_v47  ;;  %336 = vmatpush1.msra.mxu1 %v488_v48 }
  0x31   :  { %242 = vmatprep.subr.mxu0 %v500_v0  ;;  %337 = vmatprep.subr.mxu1 %v500_v0 }
  0x32   :  { %243 = vmatpush1.msra.mxu0 %v466_v49  ;;  %338 = vmatpush1.msra.mxu1 %v487_v50 }
  0x33   :  { %244 = vmatprep.subr.mxu0 %v500_v0  ;;  %339 = vmatprep.subr.mxu1 %v500_v0 }
  0x34   :  { %245 = vmatpush1.msra.mxu0 %v465_v51  ;;  %340 = vmatpush1.msra.mxu1 %v486_v52 }
  0x35   :  { %246 = vmatprep.subr.mxu0 %v500_v0  ;;  %341 = vmatprep.subr.mxu1 %v500_v0 }
  0x36   :  { %247 = vmatpush1.msra.mxu0 %v464_v53  ;;  %342 = vmatpush1.msra.mxu1 %v485_v54 }
  0x37   :  { %248 = vmatprep.subr.mxu0 %v500_v0  ;;  %343 = vmatprep.subr.mxu1 %v500_v0 }
  0x38   :  { %249 = vmatpush1.msra.mxu0 %v463_v55  ;;  %344 = vmatpush1.msra.mxu1 %v484_v56 }
  0x39   :  { %250 = vmatprep.subr.mxu0 %v500_v0  ;;  %345 = vmatprep.subr.mxu1 %v500_v0 }
  0x3a   :  { %251 = vmatpush1.msra.mxu0 %v462_v57  ;;  %346 = vmatpush1.msra.mxu1 %v483_v58 }
  0x3b   :  { %252 = vmatprep.subr.mxu0 %v500_v0  ;;  %347 = vmatprep.subr.mxu1 %v500_v0 }
  0x3c   :  { %253 = vmatpush1.msra.mxu0 %v461_v59  ;;  %348 = vmatpush1.msra.mxu1 %v482_v60 }
  0x3d   :  { %254 = vmatprep.subr.mxu0 %v500_v0  ;;  %349 = vmatprep.subr.mxu1 %v500_v0 }
  0x3e   :  { %255 = vmatpush1.msra.mxu0 %v460_v61  ;;  %350 = vmatpush1.msra.mxu1 %v481_v62 }
  0x3f   :  { %256 = vmatprep.subr.mxu0 %v500_v0  ;;  %351 = vmatprep.subr.mxu1 %v500_v0 }
  0x40   :  { %257 = vmatpush1.msra.mxu0 %v459_v63  ;;  %352 = vmatpush1.msra.mxu1 %v480_v1 }
  0x41   :  { %258 = vmatprep.subr.mxu0 %v500_v0  ;;  %353 = vmatprep.subr.mxu1 %v500_v0 }
  0x42   :  { %259 = vmatpush1.msra.mxu0 %v458_v2  ;;  %354 = vmatpush1.msra.mxu1 %v479_v3 }
  0x43   :  { %260 = vmatprep.subr.mxu0 %v500_v0  ;;  %355 = vmatprep.subr.mxu1 %v500_v0 }
  0x44   :  { %261 = vmatpush1.msra.mxu0 %v457_v4  ;;  %356 = vmatpush1.msra.mxu1 %v478_v5 }
  0x45   :  { %262 = vmatprep.subr.mxu0 %v500_v0  ;;  %357 = vmatprep.subr.mxu1 %v500_v0 }
  0x46   :  { %263 = vmatpush1.msra.mxu0 %v456_v6  ;;  %358 = vmatpush1.msra.mxu1 %v477_v7 }
  0x47   :  { %264 = vmatprep.subr.mxu0 %v500_v0  ;;  %359 = vmatprep.subr.mxu1 %v500_v0 }
  0x48   :  { %433 = vmatprep.mubr.msk.f32.mxu0 %vm37_vm0, %v17_v8  ;;  %454 = vmatprep.mubr.msk.f32.mxu1 %vm37_vm0, %v17_v8 }
  0x49   :  { %265 = vmatpush1.msra.mxu0 %v455_v9  ;;  %360 = vmatpush1.msra.mxu1 %v476_v10 }
  0x4a   :  { %114 = vmatmul.mubr.f32.gmra.mxu0 %v16_v11  ;;  %209 = vmatmul.mubr.f32.gmra.mxu1 %v16_v11 }
  0x4b   :  { %292 = vmatprep.subr.mxu0 %v500_v0  ;;  %387 = vmatprep.subr.mxu1 %v500_v0 }
  0x4c   :  { %293 = vmatpush2.msra.mxu0 %v473_v12  ;;  %388 = vmatpush2.msra.mxu1 %v494_v13 }
  0x4d   :  { %294 = vmatprep.subr.mxu0 %v500_v0  ;;  %389 = vmatprep.subr.mxu1 %v500_v0 }
  0x4e   :  { %295 = vmatpush2.msra.mxu0 %v472_v14  ;;  %390 = vmatpush2.msra.mxu1 %v493_v15 }
  0x4f   :  { %296 = vmatprep.subr.mxu0 %v500_v0  ;;  %391 = vmatprep.subr.mxu1 %v500_v0  ;;  %v501_v0 = vmov 0  }
  0x50   :  { %297 = vmatpush2.msra.mxu0 %v471_v16  ;;  %474 = vmatprep.mubr.msk.f32.mxu0 %vm37_vm0, %v672_v38 }
  0x51   :  { %392 = vmatpush2.msra.mxu1 %v492_v17  ;;  %495 = vmatprep.mubr.msk.f32.mxu1 %vm37_vm0, %v672_v38 }
  0x52   :  { %299 = vmatmul.mubr.f32.vlgmr.msra.gmra.mxu0 %v682_v40  ;;  %394 = vmatmul.mubr.f32.vlgmr.msra.gmra.mxu1 %v682_v40 }
  0x53   :  { %475 = vmatprep.mubr.msk.f32.mxu0 %vm37_vm0, %v17_v8  ;;  %496 = vmatprep.mubr.msk.f32.mxu1 %vm37_vm0, %v17_v8 }
  0x54   :  { %499 = vset.pattern.permute.xlu0 %v501_v0 }
  0x55   :  { %414 = vperm.xlu0 %499, %v410_v18  }
  0x56   :  { %304 = vmatmul.mubr.f32.gmra.mxu0 %v16_v11  ;;  %399 = vmatmul.mubr.f32.gmra.mxu1 %v16_v11 }
  0x59   :  { %419 = vperm.xlu0 %499, %v411_v19  }
  0xd0   :  { %v415_v31 = vpop.permute.xlu0 %414 }
  0xd4   :  { %v420_v45 = vpop.permute.xlu0 %419 }
  0xe8   :  { %v110_v20 = vpop.f32.mrf.mxu0  ;;  %v205_v21 = vpop.f32.mrf.mxu1 }
  0xe9   :  { %v404_v30 = vmax.f32 %v110_v20, %v205_v21 }
  0xea   :  { %v112_v22 = vpop.f32.mrf.mxu0  ;;  %v207_v23 = vpop.f32.mrf.mxu1 }
 0x10a   :  { %v115_v24 = vpop.f32.mrf.mxu0  ;;  %v210_v25 = vpop.f32.mrf.mxu1 }
 0x10b   :  { %v405_v38 = vmax.f32 %v115_v24, %v210_v25 }
 0x10c   :  { %v117_v26 = vpop.f32.mrf.mxu0  ;;  %v212_v27 = vpop.f32.mrf.mxu1 }
 0x112   :  { %v300_v28 = vpop.f32.mrf.mxu0  ;;  %v395_v29 = vpop.f32.mrf.mxu1 }
 0x113   :  { %v406_v32 = vmax.f32 %v300_v28, %v395_v29 }
 0x114   :  { %v302_v33 = vpop.f32.mrf.mxu0  ;;  %v397_v34 = vpop.f32.mrf.mxu1 }
 0x115   :  { %v408_v35 = vmax.f32 %v404_v30, %v406_v32 }
 0x116   :  { %v305_v36 = vpop.f32.mrf.mxu0  ;;  %v400_v37 = vpop.f32.mrf.mxu1 }
 0x117   :  { %v422_v39 = vadd.f32 %v415_v31, %v408_v35  ;;  %v407_v40 = vmax.f32 %v305_v36, %v400_v37 }
 0x118   :  { %v307_v41 = vpop.f32.mrf.mxu0  ;;  %v402_v42 = vpop.f32.mrf.mxu1 }
 0x119   :  { %v424_v43 = vmax.f32 %v422_v39, 0.0  ;;  %v409_v44 = vmax.f32 %v405_v38, %v407_v40 }
 0x11b   :  { %426 = vst [vmem:[%s873_s3] sm:$0xff] %v424_v43  ;;  %v423_v46 = vadd.f32 %v420_v45, %v409_v44 }
 0x11d   :  { %v425_v47 = vmax.f32 %v423_v46, 0.0 }
 0x11f   :  { %427 = vst [vmem:[%s873_s3 + $0x8] sm:$0xff] %v425_v47 }

// kernel: net_forward.5
= control target key start
LH: loop header
LB: loop body
LE: loop exit
PB: predicated region body
PF: predicated region fallthrough
CT: control target
= control target key end

     0   :  { %v622_v3 = vmov 0.0   ;;  %v623_v23 = vmov 1983009808   ;;  %v90_v25 = vlaneseq  ;;  %s979_s0 = inlined_call_operand.vmem [shape: f32[2,400], index: 0, kind: input, shape index: {}]   ;;  %s980_s1 = inlined_call_operand.vmem [shape: f32[400,128], index: 1, kind: input, shape index: {}]   ;;  %s981_s2 = inlined_call_operand.vmem [shape: f32[1,128], index: 2, kind: input, shape index: {}]   ;;  %s982_s3 = inlined_call_operand.vmem [shape: f32[128,128], index: 3, kind: input, shape index: {}]   ;;  %s983_s4 = inlined_call_operand.vmem [shape: f32[1,128], index: 4, kind: input, shape index: {}]   ;;  %s984_s5 = inlined_call_operand.vmem [shape: f32[128,128], index: 5, kind: input, shape index: {}]   ;;  %s985_s6 = inlined_call_operand.vmem [shape: f32[1,128], index: 6, kind: input, shape index: {}]   ;;  %s986_s7 = inlined_call_operand.hbm [shape: f32[2,128], index: 7, kind: output, shape index: {}]  }
   0x1   :  { %v59_v0 = vld [vmem:[%s980_s1 + $0xf8] sm:$0xff]  ;;  %179 = vmatprep.subr.mxu1 %v622_v3  ;;  %v58_v4 = vld [vmem:[%s980_s1 + $0xf0] sm:$0xff]  ;;  %v57_v7 = vld [vmem:[%s980_s1 + $0xe8] sm:$0xff]  ;;  %v88_v24 = vunpack.c.l.s4 %v623_v23 }
   0x2   :  { %v43_v1 = vld [vmem:[%s980_s1 + $0x78] sm:$0xff]  ;;  %456 = vmatprep.subr.mxu0 %v59_v0  ;;  %v42_v5 = vld [vmem:[%s980_s1 + $0x70] sm:$0xff]  ;;  %v41_v8 = vld [vmem:[%s980_s1 + $0x68] sm:$0xff]  ;;  %v91_v33 = vshrl.u32 %v90_v25, 7 }
   0x3   :  { %v75_v2 = vld [vmem:[%s980_s1 + $0x178] sm:$0xff]  ;;  %v74_v6 = vld [vmem:[%s980_s1 + $0x170] sm:$0xff]  ;;  %457 = vmatpush3.msra.mxu0 %v43_v1  ;;  %v73_v9 = vld [vmem:[%s980_s1 + $0x168] sm:$0xff]  ;;  %v89_v32 = vunpack.c.0.s8 %v88_v24 }
   0x4   :  { %180 = vmatpush1.msra.mxu1 %v75_v2  ;;  %458 = vmatprep.subr.mxu0 %v58_v4  ;;  %v56_v10 = vld [vmem:[%s980_s1 + $0xe0] sm:$0xff]  ;;  %v55_v13 = vld [vmem:[%s980_s1 + $0xd8] sm:$0xff]  ;;  %v54_v16 = vld [vmem:[%s980_s1 + $0xd0] sm:$0xff] }
   0x5   :  { %181 = vmatprep.subr.mxu1 %v622_v3  ;;  %459 = vmatpush3.msra.mxu0 %v42_v5  ;;  %v40_v11 = vld [vmem:[%s980_s1 + $0x60] sm:$0xff]  ;;  %v39_v14 = vld [vmem:[%s980_s1 + $0x58] sm:$0xff]  ;;  %v38_v17 = vld [vmem:[%s980_s1 + $0x50] sm:$0xff]  ;;  %v92_v40 = vsub.s32 %v89_v32, %v91_v33 }
   0x6   :  { %182 = vmatpush1.msra.mxu1 %v74_v6  ;;  %460 = vmatprep.subr.mxu0 %v57_v7  ;;  %v72_v12 = vld [vmem:[%s980_s1 + $0x160] sm:$0xff]  ;;  %v71_v15 = vld [vmem:[%s980_s1 + $0x158] sm:$0xff]  ;;  %v70_v18 = vld [vmem:[%s980_s1 + $0x150] sm:$0xff] }
   0x7   :  { %183 = vmatprep.subr.mxu1 %v622_v3  ;;  %461 = vmatpush3.msra.mxu0 %v41_v8  ;;  %v53_v19 = vld [vmem:[%s980_s1 + $0xc8] sm:$0xff]  ;;  %v52_v22 = vld [vmem:[%s980_s1 + $0xc0] sm:$0xff]  ;;  %v51_v28 = vld [vmem:[%s980_s1 + $0xb8] sm:$0xff] }
   0x8   :  { %184 = vmatpush1.msra.mxu1 %v73_v9  ;;  %462 = vmatprep.subr.mxu0 %v56_v10  ;;  %v37_v20 = vld [vmem:[%s980_s1 + $0x48] sm:$0xff]  ;;  %v36_v26 = vld [vmem:[%s980_s1 + $0x40] sm:$0xff]  ;;  %v35_v29 = vld [vmem:[%s980_s1 + $0x38] sm:$0xff] }
   0x9   :  { %185 = vmatprep.subr.mxu1 %v622_v3  ;;  %463 = vmatpush3.msra.mxu0 %v40_v11  ;;  %v69_v21 = vld [vmem:[%s980_s1 + $0x148] sm:$0xff]  ;;  %v68_v27 = vld [vmem:[%s980_s1 + $0x140] sm:$0xff]  ;;  %v67_v30 = vld [vmem:[%s980_s1 + $0x138] sm:$0xff] }
   0xa   :  { %186 = vmatpush1.msra.mxu1 %v72_v12  ;;  %464 = vmatprep.subr.mxu0 %v55_v13  ;;  %v50_v31 = vld [vmem:[%s980_s1 + $0xb0] sm:$0xff]  ;;  %v49_v36 = vld [vmem:[%s980_s1 + $0xa8] sm:$0xff]  ;;  %v48_v39 = vld [vmem:[%s980_s1 + $0xa0] sm:$0xff] }
   0xb   :  { %187 = vmatprep.subr.mxu1 %v622_v3  ;;  %465 = vmatpush3.msra.mxu0 %v39_v14  ;;  %v34_v34 = vld [vmem:[%s980_s1 + $0x30] sm:$0xff]  ;;  %v33_v37 = vld [vmem:[%s980_s1 + $0x28] sm:$0xff] }
   0xc   :  { %188 = vmatpush1.msra.mxu1 %v71_v15  ;;  %466 = vmatprep.subr.mxu0 %v54_v16  ;;  %v66_v35 = vld [vmem:[%s980_s1 + $0x130] sm:$0xff]  ;;  %v65_v38 = vld [vmem:[%s980_s1 + $0x128] sm:$0xff] }
   0xd   :  { %189 = vmatprep.subr.mxu1 %v622_v3  ;;  %467 = vmatpush3.msra.mxu0 %v38_v17 }
   0xe   :  { %190 = vmatpush1.msra.mxu1 %v70_v18  ;;  %468 = vmatprep.subr.mxu0 %v53_v19 }
   0xf   :  { %191 = vmatprep.subr.mxu1 %v622_v3  ;;  %469 = vmatpush3.msra.mxu0 %v37_v20 }
  0x10   :  { %192 = vmatpush1.msra.mxu1 %v69_v21  ;;  %470 = vmatprep.subr.mxu0 %v52_v22 }
  0x11   :  { %193 = vmatprep.subr.mxu1 %v622_v3  ;;  %471 = vmatpush3.msra.mxu0 %v36_v26 }
  0x12   :  { %194 = vmatpush1.msra.mxu1 %v68_v27  ;;  %472 = vmatprep.subr.mxu0 %v51_v28 }
  0x13   :  { %195 = vmatprep.subr.mxu1 %v622_v3  ;;  %473 = vmatpush3.msra.mxu0 %v35_v29 }
  0x14   :  { %196 = vmatpush1.msra.mxu1 %v67_v30  ;;  %474 = vmatprep.subr.mxu0 %v50_v31 }
  0x15   :  { %197 = vmatprep.subr.mxu1 %v622_v3  ;;  %475 = vmatpush3.msra.mxu0 %v34_v34 }
  0x16   :  { %198 = vmatpush1.msra.mxu1 %v66_v35 }
  0x17   :  { %12 = vsyncpa [#allocation3], 0  ;;  %476 = vmatprep.subr.mxu0 %v49_v36  ;;  %199 = vmatprep.subr.mxu1 %v622_v3  ;;  %v32_v41 = vld [vmem:[%s980_s1 + $0x20] sm:$0xff]  ;;  %v47_v44 = vld [vmem:[%s980_s1 + $0x98] sm:$0xff]  ;;  %vm106_vm0 = vcmask 130048   ;;  %vm624_vm1 = vmmov 0  }
  0x18   :  { %v64_v42 = vld [vmem:[%s980_s1 + $0x120] sm:$0xff]  ;;  %477 = vmatpush3.msra.mxu0 %v33_v37  ;;  %200 = vmatpush1.msra.mxu1 %v65_v38  ;;  %v31_v46 = vld [vmem:[%s980_s1 + $0x18] sm:$0xff]  ;;  %v46_v48 = vld [vmem:[%s980_s1 + $0x90] sm:$0xff]  ;;  %s625_s25 = smov [#allocation2]  }
  0x19   :  { %v27_v43 = vld [vmem:[%s979_s0] sm:$0xff]  ;;  %478 = vmatprep.subr.mxu0 %v48_v39  ;;  %201 = vmatprep.subr.mxu1 %v622_v3  ;;  %v63_v47 = vld [vmem:[%s980_s1 + $0x118] sm:$0xff]  ;;  %v30_v50 = vld [vmem:[%s980_s1 + $0x10] sm:$0xff]  ;;  %s444_s26 = sshll.u32 %s625_s25, 4  ;;  %s445_s26 = int_to_ptr.vmem [resolvable:$true] %s444_s26 }
  0x1a   :  { %v86_v45 = vcombine.high %v27_v43, %v27_v43  ;;  %479 = vmatpush3.msra.mxu0 %v32_v41  ;;  %202 = vmatpush1.msra.mxu1 %v64_v42  ;;  %v93_v49 = vrot.slane %v27_v43, %v92_v40  ;;  %v62_v51 = vld [vmem:[%s980_s1 + $0x110] sm:$0xff]  ;;  %v45_v52 = vld [vmem:[%s980_s1 + $0x88] sm:$0xff]  ;;  %v44_v56 = vld [vmem:[%s980_s1 + $0x80] sm:$0xff]  ;;  %p605_p1 = scmp.lt.s32.totalorder %s445_s26, %s445_s26 }
  0x1b   :  { %480 = vmatprep.subr.mxu0 %v47_v44  ;;  %203 = vmatprep.subr.mxu1 %v622_v3  ;;  %v29_v54 = vld [vmem:[%s980_s1 + $0x8] sm:$0xff]  ;;  %v28_v58 = vld [vmem:[%s980_s1] sm:$0xff]  ;;  %v265_v62 = vld [vmem:[%s982_s3 + $0x78] sm:$0xff] }
  0x1c   :  { %481 = vmatpush3.msra.mxu0 %v31_v46  ;;  %204 = vmatpush1.msra.mxu1 %v63_v47  ;;  %v100_v53 = vrot.slane %v86_v45, %v92_v40  ;;  %v61_v55 = vld [vmem:[%s980_s1 + $0x108] sm:$0xff]  ;;  %v101_v57 = vcombine.high %v93_v49, %v93_v49  ;;  %v60_v59 = vld [vmem:[%s980_s1 + $0x100] sm:$0xff]  ;;  %v264_v0 = vld [vmem:[%s982_s3 + $0x70] sm:$0xff] }
  0x1d   :  { %482 = vmatprep.subr.mxu0 %v46_v48  ;;  %205 = vmatprep.subr.mxu1 %v622_v3  ;;  %v77_v61 = vld [vmem:[%s980_s1 + $0x188] sm:$0xff]  ;;  %v76_v63 = vld [vmem:[%s980_s1 + $0x180] sm:$0xff]  ;;  %v261_v4 = vld [vmem:[%s982_s3 + $0x58] sm:$0xff] }
  0x1e   :  { %483 = vmatpush3.msra.mxu0 %v30_v50  ;;  %206 = vmatpush1.msra.mxu1 %v62_v51  ;;  %v102_v60 = vcombine.high %v100_v53, %v100_v53  ;;  %v263_v1 = vld [vmem:[%s982_s3 + $0x68] sm:$0xff]  ;;  %v262_v2 = vld [vmem:[%s982_s3 + $0x60] sm:$0xff]  ;;  %v260_v5 = vld [vmem:[%s982_s3 + $0x50] sm:$0xff] }
  0x1f   :  { %484 = vmatprep.subr.mxu0 %v45_v52  ;;  %207 = vmatprep.subr.mxu1 %v622_v3  ;;  %v259_v6 = vld [vmem:[%s982_s3 + $0x48] sm:$0xff]  ;;  %v258_v7 = vld [vmem:[%s982_s3 + $0x40] sm:$0xff]  ;;  %v257_v8 = vld [vmem:[%s982_s3 + $0x38] sm:$0xff] }
  0x20   :  { %485 = vmatpush3.msra.mxu0 %v29_v54  ;;  %208 = vmatpush1.msra.mxu1 %v61_v55  ;;  %v256_v9 = vld [vmem:[%s982_s3 + $0x30] sm:$0xff]  ;;  %v255_v10 = vld [vmem:[%s982_s3 + $0x28] sm:$0xff]  ;;  %v254_v11 = vld [vmem:[%s982_s3 + $0x20] sm:$0xff] }
  0x21   :  { %486 = vmatprep.subr.mxu0 %v44_v56  ;;  %209 = vmatprep.subr.mxu1 %v622_v3  ;;  %v253_v12 = vld [vmem:[%s982_s3 + $0x18] sm:$0xff]  ;;  %v252_v13 = vld [vmem:[%s982_s3 + $0x10] sm:$0xff]  ;;  %v251_v14 = vld [vmem:[%s982_s3 + $0x8] sm:$0xff] }
  0x22   :  { %487 = vmatpush3.msra.mxu0 %v28_v58  ;;  %173 = vmatprep.mubr.f32.mxu0 %v101_v57  ;;  %v250_v15 = vld [vmem:[%s982_s3] sm:$0xff]  ;;  %v359_v16 = vld [vmem:[%s984_s5 + $0x78] sm:$0xff]  ;;  %v358_v17 = vld [vmem:[%s984_s5 + $0x70] sm:$0xff] }
  0x23   :  { %210 = vmatpush1.msra.mxu1 %v60_v59  ;;  %174 = vmatmul.mubr.f32.vlgmr.msra.gmra.mxu0 %v93_v49  ;;  %v357_v18 = vld [vmem:[%s984_s5 + $0x68] sm:$0xff]  ;;  %v356_v19 = vld [vmem:[%s984_s5 + $0x60] sm:$0xff]  ;;  %v355_v20 = vld [vmem:[%s984_s5 + $0x58] sm:$0xff] }
  0x24   :  { %239 = vmatprep.subr.mxu1 %v622_v3  ;;  %453 = vmatprep.mubr.msk.f32.mxu1 %vm106_vm0, %v102_v60  ;;  %v354_v21 = vld [vmem:[%s984_s5 + $0x50] sm:$0xff]  ;;  %v353_v22 = vld [vmem:[%s984_s5 + $0x48] sm:$0xff]  ;;  %v352_v23 = vld [vmem:[%s984_s5 + $0x40] sm:$0xff] }
  0x25   :  { %240 = vmatpush2.msra.mxu1 %v77_v61  ;;  %525 = vmatprep.subr.mxu0 %v622_v3  ;;  %v351_v24 = vld [vmem:[%s984_s5 + $0x38] sm:$0xff]  ;;  %v350_v25 = vld [vmem:[%s984_s5 + $0x30] sm:$0xff]  ;;  %v349_v26 = vld [vmem:[%s984_s5 + $0x28] sm:$0xff] }
  0x26   :  { %241 = vmatprep.subr.mxu1 %v622_v3  ;;  %526 = vmatpush3.msra.mxu0 %v265_v62  ;;  %v348_v27 = vld [vmem:[%s984_s5 + $0x20] sm:$0xff]  ;;  %v347_v28 = vld [vmem:[%s984_s5 + $0x18] sm:$0xff]  ;;  %v346_v38 = vld [vmem:[%s984_s5 + $0x10] sm:$0xff] }
  0x27   :  { %242 = vmatpush2.msra.mxu1 %v76_v63  ;;  %527 = vmatprep.subr.mxu0 %v622_v3  ;;  %v452_v31 = vld [vmem:[%s981_s2] ss:$0 sm:$0xff]  ;;  %v345_v39 = vld [vmem:[%s984_s5 + $0x8] sm:$0xff] }
  0x28   :  { %244 = vmatmul.mubr.f32.vlgmr.msra.gmra.mxu1 %v100_v53  ;;  %528 = vmatpush3.msra.mxu0 %v264_v0  ;;  %v344_v40 = vld [vmem:[%s984_s5] sm:$0xff]  ;;  %s600_s5 = scalar_lea.vmem %s445_s26, 32 }
  0x29   :  { %529 = vmatprep.subr.mxu0 %v622_v3  ;;  %560 = vmatprep.subr.mxu1 %v622_v3  ;;  %v454_v41 = vld [vmem:[%s983_s4] ss:$0 sm:$0xff]  ;;  %p601_p0 = scmp.ne.s32.totalorder %s445_s26, %s600_s5  ;;  %p606_p2 = scmp.lt.s32.totalorder %s600_s5, %s600_s5 }
  0x2a   :  { %530 = vmatpush3.msra.mxu0 %v263_v1  ;;  %557 = vmatprep.mubr.msk.f32.mxu0 %vm624_vm1, %v622_v3  ;;  %v455_v46 = vld [vmem:[%s985_s6] ss:$0 sm:$0xff] }
  0x2b   :  { %531 = vmatprep.subr.mxu0 %v622_v3  ;;  %592 = vmatprep.mubr.msk.f32.mxu1 %vm624_vm1, %v622_v3  ;;  %p607_p3 = por %p606_p2, %p605_p1 }
  0x2c   :  { %532 = vmatpush3.msra.mxu0 %v262_v2  ;;  %561 = vmatpush3.msra.mxu1 %v359_v16 }
  0x2d   :  { %533 = vmatprep.subr.mxu0 %v622_v3  ;;  %562 = vmatprep.subr.mxu1 %v622_v3  ;;  %p608_p4 = pnand %p607_p3, %p601_p0 }
  0x2e   :  { %534 = vmatpush3.msra.mxu0 %v261_v4  ;;  %563 = vmatpush3.msra.mxu1 %v358_v17 }
  0x2f   :  { %535 = vmatprep.subr.mxu0 %v622_v3  ;;  %564 = vmatprep.subr.mxu1 %v622_v3 }
  0x30   :  { %536 = vmatpush3.msra.mxu0 %v260_v5  ;;  %565 = vmatpush3.msra.mxu1 %v357_v18 }
  0x31   :  { %537 = vmatprep.subr.mxu0 %v622_v3  ;;  %566 = vmatprep.subr.mxu1 %v622_v3 }
  0x32   :  { %538 = vmatpush3.msra.mxu0 %v259_v6  ;;  %567 = vmatpush3.msra.mxu1 %v356_v19 }
  0x33   :  { %539 = vmatprep.subr.mxu0 %v622_v3  ;;  %568 = vmatprep.subr.mxu1 %v622_v3 }
  0x34   :  { %540 = vmatpush3.msra.mxu0 %v258_v7  ;;  %569 = vmatpush3.msra.mxu1 %v355_v20 }
  0x35   :  { %541 = vmatprep.subr.mxu0 %v622_v3  ;;  %570 = vmatprep.subr.mxu1 %v622_v3 }
  0x36   :  { %542 = vmatpush3.msra.mxu0 %v257_v8  ;;  %571 = vmatpush3.msra.mxu1 %v354_v21 }
  0x37   :  { %543 = vmatprep.subr.mxu0 %v622_v3  ;;  %572 = vmatprep.subr.mxu1 %v622_v3 }
  0x38   :  { %544 = vmatpush3.msra.mxu0 %v256_v9  ;;  %573 = vmatpush3.msra.mxu1 %v353_v22 }
  0x39   :  { %545 = vmatprep.subr.mxu0 %v622_v3  ;;  %574 = vmatprep.subr.mxu1 %v622_v3 }
  0x3a   :  { %546 = vmatpush3.msra.mxu0 %v255_v10  ;;  %575 = vmatpush3.msra.mxu1 %v352_v23 }
  0x3b   :  { %547 = vmatprep.subr.mxu0 %v622_v3  ;;  %576 = vmatprep.subr.mxu1 %v622_v3 }
  0x3c   :  { %548 = vmatpush3.msra.mxu0 %v254_v11  ;;  %577 = vmatpush3.msra.mxu1 %v351_v24 }
  0x3d   :  { %549 = vmatprep.subr.mxu0 %v622_v3  ;;  %578 = vmatprep.subr.mxu1 %v622_v3 }
  0x3e   :  { %550 = vmatpush3.msra.mxu0 %v253_v12  ;;  %579 = vmatpush3.msra.mxu1 %v350_v25 }
  0x3f   :  { %551 = vmatprep.subr.mxu0 %v622_v3  ;;  %580 = vmatprep.subr.mxu1 %v622_v3 }
  0x40   :  { %552 = vmatpush3.msra.mxu0 %v252_v13  ;;  %581 = vmatpush3.msra.mxu1 %v349_v26 }
  0x41   :  { %553 = vmatprep.subr.mxu0 %v622_v3  ;;  %582 = vmatprep.subr.mxu1 %v622_v3 }
  0x42   :  { %554 = vmatpush3.msra.mxu0 %v251_v14  ;;  %583 = vmatpush3.msra.mxu1 %v348_v27 }
  0x43   :  { %555 = vmatprep.subr.mxu0 %v622_v3  ;;  %584 = vmatprep.subr.mxu1 %v622_v3 }
  0x44   :  { %556 = vmatpush3.msra.mxu0 %v250_v15  ;;  %585 = vmatpush3.msra.mxu1 %v347_v28 }
  0x45   :  { %586 = vmatprep.subr.mxu1 %v622_v3 }
  0x46   :  { %587 = vmatpush3.msra.mxu1 %v346_v38 }
  0x47   :  { %588 = vmatprep.subr.mxu1 %v622_v3 }
  0x48   :  { %589 = vmatpush3.msra.mxu1 %v345_v39 }
  0x49   :  { %590 = vmatprep.subr.mxu1 %v622_v3 }
  0x4a   :  { %591 = vmatpush3.msra.mxu1 %v344_v40 }
  0xe3   :  { %v488_v29 = vpop.f32.mrf.mxu0 }
  0xe5   :  { %v489_v30 = vpop.f32.mrf.mxu0 }
  0xe6   :  { %v490_v32 = vadd.f32 %v489_v30, %v488_v29 }
  0xe8   :  { %v176_v33 = vadd.f32 %v490_v32, %v452_v31  ;;  %v245_v34 = vpop.f32.mrf.mxu1 }
  0xea   :  { %v246_v35 = vadd.f32 %v245_v34, %v176_v33  ;;  %v247_v36 = vpop.f32.mrf.mxu1 }
  0xec   :  { %v249_v37 = vmax.f32 %v246_v35, 0.0 }
  0xee   :  { %558 = vmatmul.mubr.f32.vlgmr.msra.gmra.mxu0 %v249_v37 }
 0x1ae   :  { %v339_v42 = vpop.f32.mrf.mxu0 }
 0x1af   :  { %v340_v43 = vadd.f32 %v454_v41, %v339_v42 }
 0x1b0   :  { %v559_v44 = vpop.f32.mrf.mxu0 }
 0x1b1   :  { %v343_v45 = vmax.f32 %v340_v43, 0.0 }
 0x1b3   :  { %593 = vmatmul.mubr.f32.vlgmr.msra.gmra.mxu1 %v343_v45 }
 0x273   :  { %v433_v47 = vpop.f32.mrf.mxu1 }
 0x274   :  { %v434_v48 = vadd.f32 %v455_v46, %v433_v47 }
 0x275   :  { %v594_v3 = vpop.f32.mrf.mxu1 }
 0x276   :  { %437 = vst [vmem:[#allocation2] sm:$0x3] %v434_v48 }
 0x277   :  { %611 = shalt.err (!%p608_p4)
}
 0x278   :  { %447 = dma.vmem_to_hbm [thread:$0]  %s445_s26, 32, %s986_s7, [#allocation3]  }
 0x279   :  { %620 = dma.done.wait [#allocation3], 32  }
 0x27a   :  { %621 = vsyncadd [#allocation3], 4294967264 }
 0x27b   :  { %451 = vsyncpa [#allocation3], 1 }

</bundles_post_ra>
